<compile_context>
chip_gen: v7x
topology: tpu7x:2x2x1
jax: 0.10.0
libtpu: 0.0.40
codegen_flags: <defaults>
</compile_context>

<pallas_src>
import functools
import numpy as np
import jax
import jax.numpy as jnp
from jax.experimental import pallas as pl
from jax.experimental.pallas import tpu as pltpu

EPS = 1e-6  # MAE ViT uses nn.LayerNorm(eps=1e-6)
# weights the kernel consumes in the MXU compute dtype (bf16 on the fast path)
_BF16_WEIGHT_KEYS = ('w_qkv', 'w_proj', 'w_fc1', 'w_fc2')


# ----------------------------- math helpers (usable inside kernels) ----------
def _erf(x):
    # Abramowitz & Stegun 7.1.26 rational approximation, |err| < 1.5e-7,
    # so exact (erf-form) torch.nn.GELU lowers with only exp/arith. (f32 path)
    a1, a2, a3, a4, a5 = 0.254829592, -0.284496736, 1.421413741, -1.453152027, 1.061405429
    p = 0.3275911
    ax = jnp.abs(x)
    t = 1.0 / (1.0 + p * ax)
    y = 1.0 - (((((a5 * t + a4) * t + a3) * t + a2) * t + a1) * t) * jnp.exp(-ax * ax)
    return jnp.where(x >= 0, y, -y)


def _gelu_exact(x):
    # exact (erf-form) GELU, matching torch.nn.GELU() -- used on the f32 path
    return 0.5 * x * (1.0 + _erf(x * (1.0 / np.sqrt(2.0))))


def _gelu_tanh(x):
    # tanh-form GELU (fast path): transcendental goes to the EUP slot, ~3x
    # fewer VALU ops than the erf polynomial; |err| ~ 1e-3 vs exact.
    c = 0.7978845608028654  # sqrt(2/pi)
    return 0.5 * x * (1.0 + jnp.tanh(c * (x + 0.044715 * x * x * x)))


def _layernorm(x, g, b):
    mu = jnp.mean(x, axis=-1, keepdims=True)
    var = jnp.mean(jnp.square(x - mu), axis=-1, keepdims=True)
    return (x - mu) * jax.lax.rsqrt(var + EPS) * g + b


def _vmem_limit_bytes():
    # 85% of physical VMEM (128 MiB v5e/v6e, 64 MiB v7x): leave headroom for
    # Mosaic's internal scratch (score tensors, GELU input, qkv).
    try:
        cap = pltpu.get_tpu_info().vmem_capacity_bytes
    except Exception:
        cap = 64 * 1024 * 1024
    return int(cap) * 85 // 100


# ----------------------------- fused encoder kernel --------------------------
def encoder_kernel(x0_ref,
                   ln1g_ref, ln1b_ref, wqkv_ref, bqkv_ref, wproj_ref, bproj_ref,
                   ln2g_ref, ln2b_ref, wfc1_ref, bfc1_ref, wfc2_ref, bfc2_ref,
                   ng_ref, nb_ref, o_ref, x_scr, *, num_heads, n_real, npad, b_tile):
    l = pl.program_id(1)
    rows, d = x_scr.shape                                 # rows = b_tile * npad
    hd = d // num_heads
    cdt = wqkv_ref.dtype                                  # MXU compute dtype
    fast = np.dtype(cdt) != np.dtype(np.float32)          # fast math on bf16 path

    # ---- layer-0 prologue: load precomputed embeddings into the resident
    #      activation (patch-embed + pos-embed + cls were computed in XLA) ----
    @pl.when(l == 0)
    def _():
        x_scr[...] = x0_ref[0]

    x = x_scr[...]                                        # (rows, D) f32

    # -------------------------------- attention ------------------------------
    xn = _layernorm(x, ln1g_ref[0], ln1b_ref[0])
    # 1/sqrt(hd) is already folded into the q columns of w_qkv / b_qkv.
    qkv = jnp.dot(xn.astype(cdt), wqkv_ref[0],
                  preferred_element_type=jnp.float32) + bqkv_ref[0]

    kmask = None
    if npad != n_real:                                    # mask padded keys (static)
        kmask = jax.lax.broadcasted_iota(jnp.int32, (1, 1, npad), 2) < n_real

    def split_heads(t):   # (npad, H*hd) -> (H, npad, hd): one relayout, no per-head slices
        return pltpu.einshape("nhd->hnd", t.reshape(npad, num_heads, hd))

    outs = []
    for b in range(b_tile):                               # b_tile is small & static
        qkv_b = qkv[b * npad:(b + 1) * npad]              # sublane-aligned slice
        q = split_heads(qkv_b[:, :d])
        k = split_heads(qkv_b[:, d:2 * d])
        v = split_heads(qkv_b[:, 2 * d:])
        s = jnp.einsum('hqe,hke->hqk', q.astype(cdt), k.astype(cdt),
                       preferred_element_type=jnp.float32)
        if kmask is not None:
            s = jnp.where(kmask, s, -1e30)
        s = s - jnp.max(s, axis=-1, keepdims=True)
        e = jnp.exp(s)
        denom = jnp.sum(e, axis=-1, keepdims=True)
        if fast:
            p = e * pl.reciprocal(denom, approx=True)     # EUP slot, not VALU
        else:
            p = e / denom                                 # exact on f32 path
        av = jnp.einsum('hqk,hke->hqe', p.astype(cdt), v.astype(cdt),
                        preferred_element_type=jnp.float32)   # (H, npad, hd)
        # merge heads back to a lane-dense (npad, D) row block
        outs.append(pltpu.einshape("hnd->nhd", av).reshape(npad, d))
    attn = outs[0] if b_tile == 1 else jnp.concatenate(outs, axis=0)  # (rows, D)

    x = x + jnp.dot(attn.astype(cdt), wproj_ref[0],
                    preferred_element_type=jnp.float32) + bproj_ref[0]

    # ----------------------------------- MLP ---------------------------------
    xn2 = _layernorm(x, ln2g_ref[0], ln2b_ref[0])
    h1 = jnp.dot(xn2.astype(cdt), wfc1_ref[0],
                 preferred_element_type=jnp.float32) + bfc1_ref[0]
    h1 = _gelu_tanh(h1) if fast else _gelu_exact(h1)
    x = x + jnp.dot(h1.astype(cdt), wfc2_ref[0],
                    preferred_element_type=jnp.float32) + bfc2_ref[0]
    x_scr[...] = x

    # ---- final LayerNorm on the cls rows only, emitted at the last layer -----
    @pl.when(l == pl.num_programs(1) - 1)
    def _():
        if b_tile == 1:
            cls = x[0:1, :]
        else:
            cls = jnp.concatenate([x[b * npad:b * npad + 1, :] for b in range(b_tile)],
                                  axis=0)                 # (b_tile, D), sublane concat
        o_ref[...] = _layernorm(cls, ng_ref[...], nb_ref[...])


# ----------------------------- glue + pallas_call wrapper --------------------
def _patchify(imgs, p):
    # NCHW -> (B, L, C*p*p), flattening each patch in (C, ph, pw) order,
    # matching Conv2d(kernel=stride=p) weight layout + .flatten(2).transpose(1,2)
    B, C, H, W = imgs.shape
    gh, gw = H // p, W // p
    x = imgs.reshape(B, C, gh, p, gw, p)
    x = x.transpose(0, 2, 4, 1, 3, 5)
    return x.reshape(B, gh * gw, C * p * p)


def mae_encoder_linprobe_forward(imgs, params, *, patch_size, num_heads,
                                 compute_dtype=jnp.bfloat16, batch_tile=4):
    B = imgs.shape[0]
    D = params['patch_w'].shape[1]
    depth = params['w_qkv'].shape[0]
    Dh = params['w_fc1'].shape[2]

    # --- XLA-side prologue: patch-embed + bias + pos-embed + cls prepend ------
    patches = _patchify(imgs, patch_size)                       # (B, L, K) f32
    L = patches.shape[1]
    n_real = L + 1
    npad = ((n_real + 7) // 8) * 8                              # sublane-aligned tokens
    x_emb = (patches @ params['patch_w'] + params['patch_b']
             + params['pos_embed'][:, 1:, :])
    cls0 = params['cls_token'] + params['pos_embed'][:, :1, :]
    x0 = jnp.concatenate([jnp.broadcast_to(cls0, (B, 1, D)), x_emb], axis=1)
    x0 = jnp.pad(x0, ((0, 0), (0, npad - n_real), (0, 0)))      # zero padded rows

    # --- batch tiling: B_TILE images share each layer's streamed weights ------
    # (keep B / b_tile >= 2 on v7x so both TensorCores run under "parallel")
    b_tile = max(t for t in range(1, min(batch_tile, B) + 1) if B % t == 0)
    x0 = x0.reshape(B // b_tile, b_tile * npad, D).astype(jnp.float32)

    # --- fold 1/sqrt(head_dim) into the q columns of w_qkv / b_qkv ------------
    scale = (D // num_heads) ** -0.5
    w_qkv = params['w_qkv'].at[:, :, :D].multiply(scale)
    b_qkv = params['b_qkv'].at[:, :, :D].multiply(scale)

    # MXU weight operands in the compute dtype; biases / LN params stay f32.
    w_qkv_c = w_qkv.astype(compute_dtype)
    w_proj_c = params['w_proj'].astype(compute_dtype)
    w_fc1_c = params['w_fc1'].astype(compute_dtype)
    w_fc2_c = params['w_fc2'].astype(compute_dtype)

    def const_spec(shape):
        return pl.BlockSpec(shape, lambda b, l: (0,) * len(shape))

    def layer_spec(shape):
        return pl.BlockSpec((1,) + shape, lambda b, l: (l,) + (0,) * len(shape))

    kernel = functools.partial(encoder_kernel, num_heads=num_heads,
                               n_real=n_real, npad=npad, b_tile=b_tile)

    return pl.pallas_call(
        kernel,
        out_shape=jax.ShapeDtypeStruct((B, D), jnp.float32),
        grid=(B // b_tile, depth),
        in_specs=[
            pl.BlockSpec((1, b_tile * npad, D), lambda b, l: (b, 0, 0)),  # embeddings
            layer_spec((1, D)), layer_spec((1, D)),               # ln1 gamma/beta
            layer_spec((D, 3 * D)), layer_spec((1, 3 * D)),       # qkv w/b (scale folded)
            layer_spec((D, D)), layer_spec((1, D)),               # attn proj w/b
            layer_spec((1, D)), layer_spec((1, D)),               # ln2 gamma/beta
            layer_spec((D, Dh)), layer_spec((1, Dh)),             # fc1 w/b
            layer_spec((Dh, D)), layer_spec((1, D)),              # fc2 w/b
            const_spec((1, D)), const_spec((1, D)),               # final norm gamma/beta
        ],
        out_specs=pl.BlockSpec((b_tile, D), lambda b, l: (b, 0)),
        scratch_shapes=[pltpu.VMEM((b_tile * npad, D), jnp.float32)],  # resident activation
        compiler_params=pltpu.CompilerParams(
            dimension_semantics=("parallel", "arbitrary"),
            vmem_limit_bytes=_vmem_limit_bytes()),
    )(x0,
      params['ln1_g'], params['ln1_b'], w_qkv_c, b_qkv,
      w_proj_c, params['b_proj'], params['ln2_g'], params['ln2_b'],
      w_fc1_c, params['b_fc1'], w_fc2_c, params['b_fc2'],
      params['norm_g'], params['norm_b'])


# ----------------------------- deterministic parameter init ------------------
def init_params(key, *, in_chans, patch_size, embed_dim, depth, num_heads,
                mlp_ratio, num_patches):
    del num_heads
    K = in_chans * patch_size * patch_size
    Dh = embed_dim * mlp_ratio
    keys = jax.random.split(key, 11)

    def nrm(k, shape):
        return (0.02 * jax.random.normal(k, shape)).astype(jnp.float32)

    return {
        'patch_w': nrm(keys[0], (K, embed_dim)),
        'patch_b': jnp.zeros((1, embed_dim), jnp.float32),
        'cls_token': nrm(keys[1], (1, 1, embed_dim)),
        'pos_embed': nrm(keys[2], (1, num_patches + 1, embed_dim)),
        'norm_g': jnp.ones((1, embed_dim), jnp.float32),
        'norm_b': jnp.zeros((1, embed_dim), jnp.float32),
        # per-layer weights stacked along a leading depth axis (streamed by grid)
        'ln1_g': jnp.ones((depth, 1, embed_dim), jnp.float32),
        'ln1_b': jnp.zeros((depth, 1, embed_dim), jnp.float32),
        'w_qkv': nrm(keys[3], (depth, embed_dim, 3 * embed_dim)),
        'b_qkv': nrm(keys[4], (depth, 1, 3 * embed_dim)),
        'w_proj': nrm(keys[5], (depth, embed_dim, embed_dim)),
        'b_proj': nrm(keys[6], (depth, 1, embed_dim)),
        'ln2_g': jnp.ones((depth, 1, embed_dim), jnp.float32),
        'ln2_b': jnp.zeros((depth, 1, embed_dim), jnp.float32),
        'w_fc1': nrm(keys[7], (depth, embed_dim, Dh)),
        'b_fc1': nrm(keys[8], (depth, 1, Dh)),
        'w_fc2': nrm(keys[9], (depth, Dh, embed_dim)),
        'b_fc2': nrm(keys[10], (depth, 1, embed_dim)),
    }


# ----------------------------- pure-JAX reference (for validation) -----------
def ref_forward(imgs, params, *, patch_size, num_heads):
    B = imgs.shape[0]
    patches = _patchify(imgs, patch_size)
    x = patches @ params['patch_w'] + params['patch_b']
    x = x + params['pos_embed'][:, 1:, :]
    cls = params['cls_token'] + params['pos_embed'][:, :1, :]
    x = jnp.concatenate([jnp.broadcast_to(cls, (B, 1, x.shape[-1])), x], axis=1)
    D = x.shape[-1]
    hd = D // num_heads
    for i in range(params['w_qkv'].shape[0]):
        xn = _layernorm(x, params['ln1_g'][i], params['ln1_b'][i])
        qkv = xn @ params['w_qkv'][i] + params['b_qkv'][i]
        q, k, v = qkv[..., :D], qkv[..., D:2 * D], qkv[..., 2 * D:]
        q = q.reshape(B, -1, num_heads, hd).transpose(0, 2, 1, 3)
        k = k.reshape(B, -1, num_heads, hd).transpose(0, 2, 1, 3)
        v = v.reshape(B, -1, num_heads, hd).transpose(0, 2, 1, 3)
        s = (q @ jnp.swapaxes(k, -1, -2)) * (hd ** -0.5)
        a = jax.nn.softmax(s, axis=-1)
        o = (a @ v).transpose(0, 2, 1, 3).reshape(B, -1, D)
        x = x + (o @ params['w_proj'][i] + params['b_proj'][i])
        xn2 = _layernorm(x, params['ln2_g'][i], params['ln2_b'][i])
        h = jax.nn.gelu(xn2 @ params['w_fc1'][i] + params['b_fc1'][i],
                        approximate=False)
        x = x + (h @ params['w_fc2'][i] + params['b_fc2'][i])
    xf = _layernorm(x, params['norm_g'], params['norm_b'])
    return xf[:, 0]


# ----------------------------- main -------------------------------------------
if __name__ == "__main__":
    B, C, IMG, P = 2, 3, 16, 8           # batch, channels, image, patch
    D, DEPTH, HEADS, MLP = 32, 2, 4, 4   # embed dim, depth, heads, mlp ratio
    L = (IMG // P) * (IMG // P)          # number of patches (=4)

    key = jax.random.PRNGKey(0)
    kimg, kparam = jax.random.split(key)
    imgs = jax.random.normal(kimg, (B, C, IMG, IMG), jnp.float32)
    params = init_params(kparam, in_chans=C, patch_size=P, embed_dim=D,
                         depth=DEPTH, num_heads=HEADS, mlp_ratio=MLP,
                         num_patches=L)

    # 1) strict structural check: f32 compute path vs exact f32 reference.
    out_f32 = mae_encoder_linprobe_forward(imgs, params, patch_size=P,
                                           num_heads=HEADS,
                                           compute_dtype=jnp.float32)
    out_f32 = jax.block_until_ready(out_f32)
    assert out_f32.shape == (B, D)
    ref_f32 = ref_forward(imgs, params, patch_size=P, num_heads=HEADS)
    np.testing.assert_allclose(np.asarray(out_f32), np.asarray(ref_f32),
                               rtol=2e-3, atol=2e-4)

    # 2) optimized bf16-weight path vs an f32 reference that uses the same
    #    bf16-rounded per-layer weights (tolerance covers bf16 matmul inputs,
    #    the tanh-GELU and the approximate EUP reciprocal in the softmax).
    out_bf16 = mae_encoder_linprobe_forward(imgs, params, patch_size=P,
                                            num_heads=HEADS,
                                            compute_dtype=jnp.bfloat16)
    out_bf16 = jax.block_until_ready(out_bf16)
    rounded = dict(params)
    for kname in _BF16_WEIGHT_KEYS:
        rounded[kname] = params[kname].astype(jnp.bfloat16).astype(jnp.float32)
    ref_bf16 = ref_forward(imgs, rounded, patch_size=P, num_heads=HEADS)
    np.testing.assert_allclose(np.asarray(out_bf16), np.asarray(ref_bf16),
                               rtol=3e-2, atol=5e-2)

    print("KERNEL_OK")
</pallas_src>

<mosaic_0001>
module attributes {stable_mosaic.version = 11 : i64} {
  func.func @encoder_kernel(%arg0: i32, %arg1: i32, %arg2: memref<1x16x32xf32, #tpu.memory_space<vmem>>, %arg3: memref<1x1x32xf32, #tpu.memory_space<vmem>>, %arg4: memref<1x1x32xf32, #tpu.memory_space<vmem>>, %arg5: memref<1x32x96xf32, #tpu.memory_space<vmem>>, %arg6: memref<1x1x96xf32, #tpu.memory_space<vmem>>, %arg7: memref<1x32x32xf32, #tpu.memory_space<vmem>>, %arg8: memref<1x1x32xf32, #tpu.memory_space<vmem>>, %arg9: memref<1x1x32xf32, #tpu.memory_space<vmem>>, %arg10: memref<1x1x32xf32, #tpu.memory_space<vmem>>, %arg11: memref<1x32x128xf32, #tpu.memory_space<vmem>>, %arg12: memref<1x1x128xf32, #tpu.memory_space<vmem>>, %arg13: memref<1x128x32xf32, #tpu.memory_space<vmem>>, %arg14: memref<1x1x32xf32, #tpu.memory_space<vmem>>, %arg15: memref<1x32xf32, #tpu.memory_space<vmem>>, %arg16: memref<1x32xf32, #tpu.memory_space<vmem>>, %arg17: memref<2x32xf32, #tpu.memory_space<vmem>>, %arg18: memref<16x32xf32, #tpu.memory_space<vmem>>) attributes {dimension_semantics = [#tpu.dimension_semantics<parallel>, #tpu.dimension_semantics<arbitrary>], iteration_bounds = array<i64: 1, 2>, scalar_prefetch = 0 : i64, scratch_operands = 1 : i64, tpu.core_type = #tpu.core_type<tc>, window_params = [{transform_indices = @transform_0, window_bounds = array<i64: 1, 16, 32>}, {transform_indices = @transform_1, window_bounds = array<i64: 1, 1, 32>}, {transform_indices = @transform_2, window_bounds = array<i64: 1, 1, 32>}, {transform_indices = @transform_3, window_bounds = array<i64: 1, 32, 96>}, {transform_indices = @transform_4, window_bounds = array<i64: 1, 1, 96>}, {transform_indices = @transform_5, window_bounds = array<i64: 1, 32, 32>}, {transform_indices = @transform_6, window_bounds = array<i64: 1, 1, 32>}, {transform_indices = @transform_7, window_bounds = array<i64: 1, 1, 32>}, {transform_indices = @transform_8, window_bounds = array<i64: 1, 1, 32>}, {transform_indices = @transform_9, window_bounds = array<i64: 1, 32, 128>}, {transform_indices = @transform_10, window_bounds = array<i64: 1, 1, 128>}, {transform_indices = @transform_11, window_bounds = array<i64: 1, 128, 32>}, {transform_indices = @transform_12, window_bounds = array<i64: 1, 1, 32>}, {pipeline_mode = #tpu.pipeline_mode<synchronous>, transform_indices = @transform_13, window_bounds = array<i64: 1, 32>}, {pipeline_mode = #tpu.pipeline_mode<synchronous>, transform_indices = @transform_14, window_bounds = array<i64: 1, 32>}, {transform_indices = @transform_15, window_bounds = array<i64: 2, 32>}]} {
    %c0_i32 = arith.constant 0 : i32
    %0 = arith.cmpi eq, %arg1, %c0_i32 : i32
    %1 = arith.extui %0 : i1 to i32
    %c0_i32_0 = arith.constant 0 : i32
    %2 = arith.cmpi ne, %1, %c0_i32_0 : i32
    scf.if %2 {
      %c0_79 = arith.constant 0 : index
      %c0_80 = arith.constant 0 : index
      %c0_81 = arith.constant 0 : index
      %188 = vector.load %arg2[%c0_79, %c0_80, %c0_81] : memref<1x16x32xf32, #tpu.memory_space<vmem>>, vector<1x16x32xf32>
      %189 = vector.shape_cast %188 : vector<1x16x32xf32> to vector<16x32xf32>
      %c0_82 = arith.constant 0 : index
      %c0_83 = arith.constant 0 : index
      %190 = vector.load %arg18[%c0_82, %c0_83] : memref<16x32xf32, #tpu.memory_space<vmem>>, vector<16x32xf32>
      tpu.vector_store %arg18[%c0_82, %c0_83], %189 {strides = array<i32>} : memref<16x32xf32, #tpu.memory_space<vmem>>, vector<16x32xf32>,
    } else {
    }
    %c0 = arith.constant 0 : index
    %c0_1 = arith.constant 0 : index
    %3 = vector.load %arg18[%c0, %c0_1] : memref<16x32xf32, #tpu.memory_space<vmem>>, vector<16x32xf32>
    %c0_2 = arith.constant 0 : index
    %c0_3 = arith.constant 0 : index
    %c0_4 = arith.constant 0 : index
    %4 = vector.load %arg3[%c0_2, %c0_3, %c0_4] : memref<1x1x32xf32, #tpu.memory_space<vmem>>, vector<1x1x32xf32>
    %5 = vector.shape_cast %4 : vector<1x1x32xf32> to vector<1x32xf32>
    %c0_5 = arith.constant 0 : index
    %c0_6 = arith.constant 0 : index
    %c0_7 = arith.constant 0 : index
    %6 = vector.load %arg4[%c0_5, %c0_6, %c0_7] : memref<1x1x32xf32, #tpu.memory_space<vmem>>, vector<1x1x32xf32>
    %7 = vector.shape_cast %6 : vector<1x1x32xf32> to vector<1x32xf32>
    %cst = arith.constant dense<0.000000e+00> : vector<16xf32>
    %8 = vector.multi_reduction <add>, %3, %cst [1] : vector<16x32xf32> to vector<16xf32>
    %9 = vector.shape_cast %8 : vector<16xf32> to vector<16x1xf32>
    %cst_8 = arith.constant 3.200000e+01 : f32
    %10 = vector.broadcast %cst_8 : f32 to vector<16x1xf32>
    %11 = arith.divf %9, %10 : vector<16x1xf32>
    %12 = vector.broadcast %11 : vector<16x1xf32> to vector<16x32xf32>
    %13 = arith.subf %3, %12 : vector<16x32xf32>
    %14 = arith.mulf %13, %13 : vector<16x32xf32>
    %cst_9 = arith.constant dense<0.000000e+00> : vector<16xf32>
    %15 = vector.multi_reduction <add>, %14, %cst_9 [1] : vector<16x32xf32> to vector<16xf32>
    %16 = vector.shape_cast %15 : vector<16xf32> to vector<16x1xf32>
    %cst_10 = arith.constant 3.200000e+01 : f32
    %17 = vector.broadcast %cst_10 : f32 to vector<16x1xf32>
    %18 = arith.divf %16, %17 : vector<16x1xf32>
    %19 = vector.broadcast %11 : vector<16x1xf32> to vector<16x32xf32>
    %20 = arith.subf %3, %19 : vector<16x32xf32>
    %cst_11 = arith.constant 9.99999997E-7 : f32
    %21 = vector.broadcast %cst_11 : f32 to vector<16x1xf32>
    %22 = arith.addf %18, %21 : vector<16x1xf32>
    %23 = math.rsqrt %22 : vector<16x1xf32>
    %24 = vector.broadcast %23 : vector<16x1xf32> to vector<16x32xf32>
    %25 = arith.mulf %20, %24 : vector<16x32xf32>
    %26 = vector.broadcast %5 : vector<1x32xf32> to vector<16x32xf32>
    %27 = arith.mulf %25, %26 : vector<16x32xf32>
    %28 = vector.broadcast %7 : vector<1x32xf32> to vector<16x32xf32>
    %29 = arith.addf %27, %28 : vector<16x32xf32>
    %c0_12 = arith.constant 0 : index
    %c0_13 = arith.constant 0 : index
    %c0_14 = arith.constant 0 : index
    %30 = vector.load %arg5[%c0_12, %c0_13, %c0_14] : memref<1x32x96xf32, #tpu.memory_space<vmem>>, vector<1x32x96xf32>
    %31 = vector.shape_cast %30 : vector<1x32x96xf32> to vector<32x96xf32>
    %cst_15 = arith.constant dense<0.000000e+00> : vector<16x96xf32>
    %32 = tpu.matmul %29, %31, %cst_15 {dimension_numbers = #tpu.dot_dimension_numbers<[1], [0], [0], [1], [0, 0, 1, 1], [], []>} : vector<16x32xf32>, vector<32x96xf32>, vector<16x96xf32> -> vector<16x96xf32>
    %c0_16 = arith.constant 0 : index
    %c0_17 = arith.constant 0 : index
    %c0_18 = arith.constant 0 : index
    %33 = vector.load %arg6[%c0_16, %c0_17, %c0_18] : memref<1x1x96xf32, #tpu.memory_space<vmem>>, vector<1x1x96xf32>
    %34 = vector.shape_cast %33 : vector<1x1x96xf32> to vector<1x96xf32>
    %35 = vector.broadcast %34 : vector<1x96xf32> to vector<16x96xf32>
    %36 = arith.addf %32, %35 : vector<16x96xf32>
    %37 = tpu.iota {dimensions = array<i32: 2>} : vector<1x1x8xi32>
    %c5_i32 = arith.constant 5 : i32
    %38 = vector.broadcast %c5_i32 : i32 to vector<1x1x8xi32>
    %39 = arith.cmpi slt, %37, %38 : vector<1x1x8xi32>
    %40 = vector.extract_strided_slice %36 {offsets = [0, 0], sizes = [8, 96], strides = [1, 1]} : vector<16x96xf32> to vector<8x96xf32>
    %41 = vector.extract_strided_slice %40 {offsets = [0, 0], sizes = [8, 32], strides = [1, 1]} : vector<8x96xf32> to vector<8x32xf32>
    %42 = vector.shape_cast %41 : vector<8x32xf32> to vector<8x4x8xf32>
    %43 = tpu.transpose %42, [1, 0, 2] : vector<8x4x8xf32> -> vector<4x8x8xf32>
    %44 = vector.extract_strided_slice %40 {offsets = [0, 32], sizes = [8, 32], strides = [1, 1]} : vector<8x96xf32> to vector<8x32xf32>
    %45 = vector.shape_cast %44 : vector<8x32xf32> to vector<8x4x8xf32>
    %46 = tpu.transpose %45, [1, 0, 2] : vector<8x4x8xf32> -> vector<4x8x8xf32>
    %47 = vector.extract_strided_slice %40 {offsets = [0, 64], sizes = [8, 32], strides = [1, 1]} : vector<8x96xf32> to vector<8x32xf32>
    %48 = vector.shape_cast %47 : vector<8x32xf32> to vector<8x4x8xf32>
    %49 = tpu.transpose %48, [1, 0, 2] : vector<8x4x8xf32> -> vector<4x8x8xf32>
    "tpu.trace_start"() <{level = 10 : i32, message = "hqe,hke->hqk"}> : () -> ()
    %cst_19 = arith.constant dense<0.000000e+00> : vector<4x8x8xf32>
    %50 = tpu.matmul %43, %46, %cst_19 {dimension_numbers = #tpu.dot_dimension_numbers<[2], [2], [1], [1], [0, 0, 0, 1, 1, 1], [0], [0]>} : vector<4x8x8xf32>, vector<4x8x8xf32>, vector<4x8x8xf32> -> vector<4x8x8xf32>
    %cst_20 = arith.constant -1.000000e+30 : f32
    "tpu.trace_stop"() : () -> ()
    %51 = vector.shape_cast %39 : vector<1x1x8xi1> to vector<1x1x8xi1>
    %52 = vector.broadcast %51 : vector<1x1x8xi1> to vector<4x8x8xi1>
    %53 = vector.broadcast %cst_20 : f32 to vector<4x8x8xf32>
    %54 = arith.select %52, %50, %53 : vector<4x8x8xi1>, vector<4x8x8xf32>
    %cst_21 = arith.constant dense<0xFF800000> : vector<4x8xf32>
    %55 = vector.multi_reduction <maximumf>, %54, %cst_21 [2] : vector<4x8x8xf32> to vector<4x8xf32>
    %56 = vector.shape_cast %55 : vector<4x8xf32> to vector<4x8x1xf32>
    %57 = vector.broadcast %56 : vector<4x8x1xf32> to vector<4x8x8xf32>
    %58 = arith.subf %54, %57 : vector<4x8x8xf32>
    %59 = math.exp %58 : vector<4x8x8xf32>
    %cst_22 = arith.constant dense<0.000000e+00> : vector<4x8xf32>
    %60 = vector.multi_reduction <add>, %59, %cst_22 [2] : vector<4x8x8xf32> to vector<4x8xf32>
    %61 = vector.shape_cast %60 : vector<4x8xf32> to vector<4x8x1xf32>
    %62 = vector.broadcast %61 : vector<4x8x1xf32> to vector<4x8x8xf32>
    %63 = arith.divf %59, %62 : vector<4x8x8xf32>
    "tpu.trace_start"() <{level = 10 : i32, message = "hqk,hke->hqe"}> : () -> ()
    %cst_23 = arith.constant dense<0.000000e+00> : vector<4x8x8xf32>
    %64 = tpu.matmul %63, %49, %cst_23 {dimension_numbers = #tpu.dot_dimension_numbers<[2], [1], [1], [2], [0, 0, 0, 1, 1, 2], [0], [0]>} : vector<4x8x8xf32>, vector<4x8x8xf32>, vector<4x8x8xf32> -> vector<4x8x8xf32>
    "tpu.trace_stop"() : () -> ()
    %65 = tpu.transpose %64, [1, 0, 2] : vector<4x8x8xf32> -> vector<8x4x8xf32>
    %66 = vector.shape_cast %65 : vector<8x4x8xf32> to vector<8x32xf32>
    %67 = vector.extract_strided_slice %36 {offsets = [8, 0], sizes = [8, 96], strides = [1, 1]} : vector<16x96xf32> to vector<8x96xf32>
    %68 = vector.extract_strided_slice %67 {offsets = [0, 0], sizes = [8, 32], strides = [1, 1]} : vector<8x96xf32> to vector<8x32xf32>
    %69 = vector.shape_cast %68 : vector<8x32xf32> to vector<8x4x8xf32>
    %70 = tpu.transpose %69, [1, 0, 2] : vector<8x4x8xf32> -> vector<4x8x8xf32>
    %71 = vector.extract_strided_slice %67 {offsets = [0, 32], sizes = [8, 32], strides = [1, 1]} : vector<8x96xf32> to vector<8x32xf32>
    %72 = vector.shape_cast %71 : vector<8x32xf32> to vector<8x4x8xf32>
    %73 = tpu.transpose %72, [1, 0, 2] : vector<8x4x8xf32> -> vector<4x8x8xf32>
    %74 = vector.extract_strided_slice %67 {offsets = [0, 64], sizes = [8, 32], strides = [1, 1]} : vector<8x96xf32> to vector<8x32xf32>
    %75 = vector.shape_cast %74 : vector<8x32xf32> to vector<8x4x8xf32>
    %76 = tpu.transpose %75, [1, 0, 2] : vector<8x4x8xf32> -> vector<4x8x8xf32>
    "tpu.trace_start"() <{level = 10 : i32, message = "hqe,hke->hqk"}> : () -> ()
    %cst_24 = arith.constant dense<0.000000e+00> : vector<4x8x8xf32>
    %77 = tpu.matmul %70, %73, %cst_24 {dimension_numbers = #tpu.dot_dimension_numbers<[2], [2], [1], [1], [0, 0, 0, 1, 1, 1], [0], [0]>} : vector<4x8x8xf32>, vector<4x8x8xf32>, vector<4x8x8xf32> -> vector<4x8x8xf32>
    %cst_25 = arith.constant -1.000000e+30 : f32
    "tpu.trace_stop"() : () -> ()
    %78 = vector.shape_cast %39 : vector<1x1x8xi1> to vector<1x1x8xi1>
    %79 = vector.broadcast %78 : vector<1x1x8xi1> to vector<4x8x8xi1>
    %80 = vector.broadcast %cst_25 : f32 to vector<4x8x8xf32>
    %81 = arith.select %79, %77, %80 : vector<4x8x8xi1>, vector<4x8x8xf32>
    %cst_26 = arith.constant dense<0xFF800000> : vector<4x8xf32>
    %82 = vector.multi_reduction <maximumf>, %81, %cst_26 [2] : vector<4x8x8xf32> to vector<4x8xf32>
    %83 = vector.shape_cast %82 : vector<4x8xf32> to vector<4x8x1xf32>
    %84 = vector.broadcast %83 : vector<4x8x1xf32> to vector<4x8x8xf32>
    %85 = arith.subf %81, %84 : vector<4x8x8xf32>
    %86 = math.exp %85 : vector<4x8x8xf32>
    %cst_27 = arith.constant dense<0.000000e+00> : vector<4x8xf32>
    %87 = vector.multi_reduction <add>, %86, %cst_27 [2] : vector<4x8x8xf32> to vector<4x8xf32>
    %88 = vector.shape_cast %87 : vector<4x8xf32> to vector<4x8x1xf32>
    %89 = vector.broadcast %88 : vector<4x8x1xf32> to vector<4x8x8xf32>
    %90 = arith.divf %86, %89 : vector<4x8x8xf32>
    "tpu.trace_start"() <{level = 10 : i32, message = "hqk,hke->hqe"}> : () -> ()
    %cst_28 = arith.constant dense<0.000000e+00> : vector<4x8x8xf32>
    %91 = tpu.matmul %90, %76, %cst_28 {dimension_numbers = #tpu.dot_dimension_numbers<[2], [1], [1], [2], [0, 0, 0, 1, 1, 2], [0], [0]>} : vector<4x8x8xf32>, vector<4x8x8xf32>, vector<4x8x8xf32> -> vector<4x8x8xf32>
    "tpu.trace_stop"() : () -> ()
    %92 = tpu.transpose %91, [1, 0, 2] : vector<4x8x8xf32> -> vector<8x4x8xf32>
    %93 = vector.shape_cast %92 : vector<8x4x8xf32> to vector<8x32xf32>
    %94 = tpu.concatenate %66, %93 in 0 : vector<8x32xf32>, vector<8x32xf32> -> vector<16x32xf32>
    %c0_29 = arith.constant 0 : index
    %c0_30 = arith.constant 0 : index
    %c0_31 = arith.constant 0 : index
    %95 = vector.load %arg7[%c0_29, %c0_30, %c0_31] : memref<1x32x32xf32, #tpu.memory_space<vmem>>, vector<1x32x32xf32>
    %96 = vector.shape_cast %95 : vector<1x32x32xf32> to vector<32x32xf32>
    %cst_32 = arith.constant dense<0.000000e+00> : vector<16x32xf32>
    %97 = tpu.matmul %94, %96, %cst_32 {dimension_numbers = #tpu.dot_dimension_numbers<[1], [0], [0], [1], [0, 0, 1, 1], [], []>} : vector<16x32xf32>, vector<32x32xf32>, vector<16x32xf32> -> vector<16x32xf32>
    %98 = arith.addf %3, %97 : vector<16x32xf32>
    %c0_33 = arith.constant 0 : index
    %c0_34 = arith.constant 0 : index
    %c0_35 = arith.constant 0 : index
    %99 = vector.load %arg8[%c0_33, %c0_34, %c0_35] : memref<1x1x32xf32, #tpu.memory_space<vmem>>, vector<1x1x32xf32>
    %100 = vector.shape_cast %99 : vector<1x1x32xf32> to vector<1x32xf32>
    %101 = vector.broadcast %100 : vector<1x32xf32> to vector<16x32xf32>
    %102 = arith.addf %98, %101 : vector<16x32xf32>
    %c0_36 = arith.constant 0 : index
    %c0_37 = arith.constant 0 : index
    %c0_38 = arith.constant 0 : index
    %103 = vector.load %arg9[%c0_36, %c0_37, %c0_38] : memref<1x1x32xf32, #tpu.memory_space<vmem>>, vector<1x1x32xf32>
    %104 = vector.shape_cast %103 : vector<1x1x32xf32> to vector<1x32xf32>
    %c0_39 = arith.constant 0 : index
    %c0_40 = arith.constant 0 : index
    %c0_41 = arith.constant 0 : index
    %105 = vector.load %arg10[%c0_39, %c0_40, %c0_41] : memref<1x1x32xf32, #tpu.memory_space<vmem>>, vector<1x1x32xf32>
    %106 = vector.shape_cast %105 : vector<1x1x32xf32> to vector<1x32xf32>
    %cst_42 = arith.constant dense<0.000000e+00> : vector<16xf32>
    %107 = vector.multi_reduction <add>, %102, %cst_42 [1] : vector<16x32xf32> to vector<16xf32>
    %108 = vector.shape_cast %107 : vector<16xf32> to vector<16x1xf32>
    %cst_43 = arith.constant 3.200000e+01 : f32
    %109 = vector.broadcast %cst_43 : f32 to vector<16x1xf32>
    %110 = arith.divf %108, %109 : vector<16x1xf32>
    %111 = vector.broadcast %110 : vector<16x1xf32> to vector<16x32xf32>
    %112 = arith.subf %102, %111 : vector<16x32xf32>
    %113 = arith.mulf %112, %112 : vector<16x32xf32>
    %cst_44 = arith.constant dense<0.000000e+00> : vector<16xf32>
    %114 = vector.multi_reduction <add>, %113, %cst_44 [1] : vector<16x32xf32> to vector<16xf32>
    %115 = vector.shape_cast %114 : vector<16xf32> to vector<16x1xf32>
    %cst_45 = arith.constant 3.200000e+01 : f32
    %116 = vector.broadcast %cst_45 : f32 to vector<16x1xf32>
    %117 = arith.divf %115, %116 : vector<16x1xf32>
    %118 = vector.broadcast %110 : vector<16x1xf32> to vector<16x32xf32>
    %119 = arith.subf %102, %118 : vector<16x32xf32>
    %cst_46 = arith.constant 9.99999997E-7 : f32
    %120 = vector.broadcast %cst_46 : f32 to vector<16x1xf32>
    %121 = arith.addf %117, %120 : vector<16x1xf32>
    %122 = math.rsqrt %121 : vector<16x1xf32>
    %123 = vector.broadcast %122 : vector<16x1xf32> to vector<16x32xf32>
    %124 = arith.mulf %119, %123 : vector<16x32xf32>
    %125 = vector.broadcast %104 : vector<1x32xf32> to vector<16x32xf32>
    %126 = arith.mulf %124, %125 : vector<16x32xf32>
    %127 = vector.broadcast %106 : vector<1x32xf32> to vector<16x32xf32>
    %128 = arith.addf %126, %127 : vector<16x32xf32>
    %c0_47 = arith.constant 0 : index
    %c0_48 = arith.constant 0 : index
    %c0_49 = arith.constant 0 : index
    %129 = vector.load %arg11[%c0_47, %c0_48, %c0_49] : memref<1x32x128xf32, #tpu.memory_space<vmem>>, vector<1x32x128xf32>
    %130 = vector.shape_cast %129 : vector<1x32x128xf32> to vector<32x128xf32>
    %cst_50 = arith.constant dense<0.000000e+00> : vector<16x128xf32>
    %131 = tpu.matmul %128, %130, %cst_50 {dimension_numbers = #tpu.dot_dimension_numbers<[1], [0], [0], [1], [0, 0, 1, 1], [], []>} : vector<16x32xf32>, vector<32x128xf32>, vector<16x128xf32> -> vector<16x128xf32>
    %c0_51 = arith.constant 0 : index
    %c0_52 = arith.constant 0 : index
    %c0_53 = arith.constant 0 : index
    %132 = vector.load %arg12[%c0_51, %c0_52, %c0_53] : memref<1x1x128xf32, #tpu.memory_space<vmem>>, vector<1x1x128xf32>
    %133 = vector.shape_cast %132 : vector<1x1x128xf32> to vector<1x128xf32>
    %134 = vector.broadcast %133 : vector<1x128xf32> to vector<16x128xf32>
    %135 = arith.addf %131, %134 : vector<16x128xf32>
    %cst_54 = arith.constant 5.000000e-01 : f32
    %136 = vector.broadcast %cst_54 : f32 to vector<16x128xf32>
    %137 = arith.mulf %136, %135 : vector<16x128xf32>
    %cst_55 = arith.constant 0.707106769 : f32
    %138 = vector.broadcast %cst_55 : f32 to vector<16x128xf32>
    %139 = arith.mulf %135, %138 : vector<16x128xf32>
    %140 = math.absf %139 : vector<16x128xf32>
    %cst_56 = arith.constant 0.327591091 : f32
    %141 = vector.broadcast %cst_56 : f32 to vector<16x128xf32>
    %142 = arith.mulf %141, %140 : vector<16x128xf32>
    %cst_57 = arith.constant 1.000000e+00 : f32
    %143 = vector.broadcast %cst_57 : f32 to vector<16x128xf32>
    %144 = arith.addf %143, %142 : vector<16x128xf32>
    %cst_58 = arith.constant 1.000000e+00 : f32
    %145 = vector.broadcast %cst_58 : f32 to vector<16x128xf32>
    %146 = arith.divf %145, %144 : vector<16x128xf32>
    %cst_59 = arith.constant 1.06140542 : f32
    %147 = vector.broadcast %cst_59 : f32 to vector<16x128xf32>
    %148 = arith.mulf %147, %146 : vector<16x128xf32>
    %cst_60 = arith.constant -1.45315206 : f32
    %149 = vector.broadcast %cst_60 : f32 to vector<16x128xf32>
    %150 = arith.addf %148, %149 : vector<16x128xf32>
    %151 = arith.mulf %150, %146 : vector<16x128xf32>
    %cst_61 = arith.constant 1.42141378 : f32
    %152 = vector.broadcast %cst_61 : f32 to vector<16x128xf32>
    %153 = arith.addf %151, %152 : vector<16x128xf32>
    %154 = arith.mulf %153, %146 : vector<16x128xf32>
    %cst_62 = arith.constant -0.284496725 : f32
    %155 = vector.broadcast %cst_62 : f32 to vector<16x128xf32>
    %156 = arith.addf %154, %155 : vector<16x128xf32>
    %157 = arith.mulf %156, %146 : vector<16x128xf32>
    %cst_63 = arith.constant 0.254829586 : f32
    %158 = vector.broadcast %cst_63 : f32 to vector<16x128xf32>
    %159 = arith.addf %157, %158 : vector<16x128xf32>
    %160 = arith.mulf %159, %146 : vector<16x128xf32>
    %cst_64 = arith.constant 0.000000e+00 : f32
    %161 = vector.broadcast %cst_64 : f32 to vector<16x128xf32>
    %162 = arith.subf %161, %140 : vector<16x128xf32>
    %163 = arith.mulf %162, %140 : vector<16x128xf32>
    %164 = math.exp %163 : vector<16x128xf32>
    %165 = arith.mulf %160, %164 : vector<16x128xf32>
    %cst_65 = arith.constant 1.000000e+00 : f32
    %166 = vector.broadcast %cst_65 : f32 to vector<16x128xf32>
    %167 = arith.subf %166, %165 : vector<16x128xf32>
    %cst_66 = arith.constant 0.000000e+00 : f32
    %168 = vector.broadcast %cst_66 : f32 to vector<16x128xf32>
    %169 = arith.cmpf oge, %139, %168 : vector<16x128xf32>
    %cst_67 = arith.constant 0.000000e+00 : f32
    %170 = vector.broadcast %cst_67 : f32 to vector<16x128xf32>
    %171 = arith.subf %170, %167 : vector<16x128xf32>
    %172 = arith.select %169, %167, %171 : vector<16x128xi1>, vector<16x128xf32>
    %cst_68 = arith.constant 1.000000e+00 : f32
    %173 = vector.broadcast %cst_68 : f32 to vector<16x128xf32>
    %174 = arith.addf %173, %172 : vector<16x128xf32>
    %175 = arith.mulf %137, %174 : vector<16x128xf32>
    %c0_69 = arith.constant 0 : index
    %c0_70 = arith.constant 0 : index
    %c0_71 = arith.constant 0 : index
    %176 = vector.load %arg13[%c0_69, %c0_70, %c0_71] : memref<1x128x32xf32, #tpu.memory_space<vmem>>, vector<1x128x32xf32>
    %177 = vector.shape_cast %176 : vector<1x128x32xf32> to vector<128x32xf32>
    %cst_72 = arith.constant dense<0.000000e+00> : vector<16x32xf32>
    %178 = tpu.matmul %175, %177, %cst_72 {dimension_numbers = #tpu.dot_dimension_numbers<[1], [0], [0], [1], [0, 0, 1, 1], [], []>} : vector<16x128xf32>, vector<128x32xf32>, vector<16x32xf32> -> vector<16x32xf32>
    %179 = arith.addf %102, %178 : vector<16x32xf32>
    %c0_73 = arith.constant 0 : index
    %c0_74 = arith.constant 0 : index
    %c0_75 = arith.constant 0 : index
    %180 = vector.load %arg14[%c0_73, %c0_74, %c0_75] : memref<1x1x32xf32, #tpu.memory_space<vmem>>, vector<1x1x32xf32>
    %181 = vector.shape_cast %180 : vector<1x1x32xf32> to vector<1x32xf32>
    %182 = vector.broadcast %181 : vector<1x32xf32> to vector<16x32xf32>
    %183 = arith.addf %179, %182 : vector<16x32xf32>
    %c0_76 = arith.constant 0 : index
    %c0_77 = arith.constant 0 : index
    %184 = vector.load %arg18[%c0_76, %c0_77] : memref<16x32xf32, #tpu.memory_space<vmem>>, vector<16x32xf32>
    tpu.vector_store %arg18[%c0_76, %c0_77], %183 {strides = array<i32>} : memref<16x32xf32, #tpu.memory_space<vmem>>, vector<16x32xf32>,
    %c1_i32 = arith.constant 1 : i32
    %185 = arith.cmpi eq, %arg1, %c1_i32 : i32
    %186 = arith.extui %185 : i1 to i32
    %c0_i32_78 = arith.constant 0 : i32
    %187 = arith.cmpi ne, %186, %c0_i32_78 : i32
    scf.if %187 {
      %188 = vector.extract_strided_slice %183 {offsets = [0, 0], sizes = [1, 32], strides = [1, 1]} : vector<16x32xf32> to vector<1x32xf32>
      %189 = vector.extract_strided_slice %183 {offsets = [8, 0], sizes = [1, 32], strides = [1, 1]} : vector<16x32xf32> to vector<1x32xf32>
      %190 = tpu.concatenate %188, %189 in 0 : vector<1x32xf32>, vector<1x32xf32> -> vector<2x32xf32>
      %c0_79 = arith.constant 0 : index
      %c0_80 = arith.constant 0 : index
      %191 = vector.load %arg15[%c0_79, %c0_80] : memref<1x32xf32, #tpu.memory_space<vmem>>, vector<1x32xf32>
      %c0_81 = arith.constant 0 : index
      %c0_82 = arith.constant 0 : index
      %192 = vector.load %arg16[%c0_81, %c0_82] : memref<1x32xf32, #tpu.memory_space<vmem>>, vector<1x32xf32>
      %cst_83 = arith.constant dense<0.000000e+00> : vector<2xf32>
      %193 = vector.multi_reduction <add>, %190, %cst_83 [1] : vector<2x32xf32> to vector<2xf32>
      %194 = vector.shape_cast %193 : vector<2xf32> to vector<2x1xf32>
      %cst_84 = arith.constant 3.200000e+01 : f32
      %195 = vector.broadcast %cst_84 : f32 to vector<2x1xf32>
      %196 = arith.divf %194, %195 : vector<2x1xf32>
      %197 = vector.broadcast %196 : vector<2x1xf32> to vector<2x32xf32>
      %198 = arith.subf %190, %197 : vector<2x32xf32>
      %199 = arith.mulf %198, %198 : vector<2x32xf32>
      %cst_85 = arith.constant dense<0.000000e+00> : vector<2xf32>
      %200 = vector.multi_reduction <add>, %199, %cst_85 [1] : vector<2x32xf32> to vector<2xf32>
      %201 = vector.shape_cast %200 : vector<2xf32> to vector<2x1xf32>
      %cst_86 = arith.constant 3.200000e+01 : f32
      %202 = vector.broadcast %cst_86 : f32 to vector<2x1xf32>
      %203 = arith.divf %201, %202 : vector<2x1xf32>
      %204 = vector.broadcast %196 : vector<2x1xf32> to vector<2x32xf32>
      %205 = arith.subf %190, %204 : vector<2x32xf32>
      %cst_87 = arith.constant 9.99999997E-7 : f32
      %206 = vector.broadcast %cst_87 : f32 to vector<2x1xf32>
      %207 = arith.addf %203, %206 : vector<2x1xf32>
      %208 = math.rsqrt %207 : vector<2x1xf32>
      %209 = vector.broadcast %208 : vector<2x1xf32> to vector<2x32xf32>
      %210 = arith.mulf %205, %209 : vector<2x32xf32>
      %211 = vector.broadcast %191 : vector<1x32xf32> to vector<2x32xf32>
      %212 = arith.mulf %210, %211 : vector<2x32xf32>
      %213 = vector.broadcast %192 : vector<1x32xf32> to vector<2x32xf32>
      %214 = arith.addf %212, %213 : vector<2x32xf32>
      %c0_88 = arith.constant 0 : index
      %c0_89 = arith.constant 0 : index
      %215 = vector.load %arg17[%c0_88, %c0_89] : memref<2x32xf32, #tpu.memory_space<vmem>>, vector<2x32xf32>
      tpu.vector_store %arg17[%c0_88, %c0_89], %214 {strides = array<i32>} : memref<2x32xf32, #tpu.memory_space<vmem>>, vector<2x32xf32>,
    } else {
    }
    return
  }
  func.func @transform_0(%arg0: i32, %arg1: i32) -> (i32, i32, i32) {
    %c0_i32 = arith.constant 0 : i32
    %c0_i32_0 = arith.constant 0 : i32
    %c0_i32_1 = arith.constant 0 : i32
    return %arg0, %c0_i32, %c0_i32_0 : i32, i32, i32
  }
  func.func @transform_1(%arg0: i32, %arg1: i32) -> (i32, i32, i32) {
    %c0_i32 = arith.constant 0 : i32
    %c0_i32_0 = arith.constant 0 : i32
    %c0_i32_1 = arith.constant 0 : i32
    return %arg1, %c0_i32, %c0_i32_0 : i32, i32, i32
  }
  func.func @transform_2(%arg0: i32, %arg1: i32) -> (i32, i32, i32) {
    %c0_i32 = arith.constant 0 : i32
    %c0_i32_0 = arith.constant 0 : i32
    %c0_i32_1 = arith.constant 0 : i32
    return %arg1, %c0_i32, %c0_i32_0 : i32, i32, i32
  }
  func.func @transform_3(%arg0: i32, %arg1: i32) -> (i32, i32, i32) {
    %c0_i32 = arith.constant 0 : i32
    %c0_i32_0 = arith.constant 0 : i32
    %c0_i32_1 = arith.constant 0 : i32
    return %arg1, %c0_i32, %c0_i32_0 : i32, i32, i32
  }
  func.func @transform_4(%arg0: i32, %arg1: i32) -> (i32, i32, i32) {
    %c0_i32 = arith.constant 0 : i32
    %c0_i32_0 = arith.constant 0 : i32
    %c0_i32_1 = arith.constant 0 : i32
    return %arg1, %c0_i32, %c0_i32_0 : i32, i32, i32
  }
  func.func @transform_5(%arg0: i32, %arg1: i32) -> (i32, i32, i32) {
    %c0_i32 = arith.constant 0 : i32
    %c0_i32_0 = arith.constant 0 : i32
    %c0_i32_1 = arith.constant 0 : i32
    return %arg1, %c0_i32, %c0_i32_0 : i32, i32, i32
  }
  func.func @transform_6(%arg0: i32, %arg1: i32) -> (i32, i32, i32) {
    %c0_i32 = arith.constant 0 : i32
    %c0_i32_0 = arith.constant 0 : i32
    %c0_i32_1 = arith.constant 0 : i32
    return %arg1, %c0_i32, %c0_i32_0 : i32, i32, i32
  }
  func.func @transform_7(%arg0: i32, %arg1: i32) -> (i32, i32, i32) {
    %c0_i32 = arith.constant 0 : i32
    %c0_i32_0 = arith.constant 0 : i32
    %c0_i32_1 = arith.constant 0 : i32
    return %arg1, %c0_i32, %c0_i32_0 : i32, i32, i32
  }
  func.func @transform_8(%arg0: i32, %arg1: i32) -> (i32, i32, i32) {
    %c0_i32 = arith.constant 0 : i32
    %c0_i32_0 = arith.constant 0 : i32
    %c0_i32_1 = arith.constant 0 : i32
    return %arg1, %c0_i32, %c0_i32_0 : i32, i32, i32
  }
  func.func @transform_9(%arg0: i32, %arg1: i32) -> (i32, i32, i32) {
    %c0_i32 = arith.constant 0 : i32
    %c0_i32_0 = arith.constant 0 : i32
    %c0_i32_1 = arith.constant 0 : i32
    return %arg1, %c0_i32, %c0_i32_0 : i32, i32, i32
  }
  func.func @transform_10(%arg0: i32, %arg1: i32) -> (i32, i32, i32) {
    %c0_i32 = arith.constant 0 : i32
    %c0_i32_0 = arith.constant 0 : i32
    %c0_i32_1 = arith.constant 0 : i32
    return %arg1, %c0_i32, %c0_i32_0 : i32, i32, i32
  }
  func.func @transform_11(%arg0: i32, %arg1: i32) -> (i32, i32, i32) {
    %c0_i32 = arith.constant 0 : i32
    %c0_i32_0 = arith.constant 0 : i32
    %c0_i32_1 = arith.constant 0 : i32
    return %arg1, %c0_i32, %c0_i32_0 : i32, i32, i32
  }
  func.func @transform_12(%arg0: i32, %arg1: i32) -> (i32, i32, i32) {
    %c0_i32 = arith.constant 0 : i32
    %c0_i32_0 = arith.constant 0 : i32
    %c0_i32_1 = arith.constant 0 : i32
    return %arg1, %c0_i32, %c0_i32_0 : i32, i32, i32
  }
  func.func @transform_13(%arg0: i32, %arg1: i32) -> (i32, i32) {
    %c0_i32 = arith.constant 0 : i32
    %c0_i32_0 = arith.constant 0 : i32
    %c0_i32_1 = arith.constant 0 : i32
    return %c0_i32, %c0_i32_0 : i32, i32
  }
  func.func @transform_14(%arg0: i32, %arg1: i32) -> (i32, i32) {
    %c0_i32 = arith.constant 0 : i32
    %c0_i32_0 = arith.constant 0 : i32
    %c0_i32_1 = arith.constant 0 : i32
    return %c0_i32, %c0_i32_0 : i32, i32
  }
  func.func @transform_15(%arg0: i32, %arg1: i32) -> (i32, i32) {
    %c0_i32 = arith.constant 0 : i32
    %c0_i32_0 = arith.constant 0 : i32
    return %arg0, %c0_i32 : i32, i32
  }
}

</mosaic_0001>

<bundles_post_ra>
// kernel: tpu_custom_call.1
= control target key start
LH: loop header
LB: loop body
LE: loop exit
PB: predicated region body
PF: predicated region fallthrough
CT: control target
= control target key end

     0   :  { %s5132_s0 = inlined_call_operand.vmem [shape: f32[1,16,32], index: 0, kind: input, shape index: {}]   ;;  %s5133_s1 = inlined_call_operand.vmem [shape: f32[2,1,32], index: 1, kind: input, shape index: {}]   ;;  %s5134_s2 = inlined_call_operand.vmem [shape: f32[2,1,32], index: 2, kind: input, shape index: {}]   ;;  %s5135_s3 = inlined_call_operand.vmem [shape: f32[2,32,96], index: 3, kind: input, shape index: {}]   ;;  %s5136_s4 = inlined_call_operand.vmem [shape: f32[2,1,96], index: 4, kind: input, shape index: {}]   ;;  %s5137_s5 = inlined_call_operand.vmem [shape: f32[2,32,32], index: 5, kind: input, shape index: {}]   ;;  %s5138_s6 = inlined_call_operand.vmem [shape: f32[2,1,32], index: 6, kind: input, shape index: {}]   ;;  %s5139_s7 = inlined_call_operand.vmem [shape: f32[2,1,32], index: 7, kind: input, shape index: {}]   ;;  %s5140_s8 = inlined_call_operand.vmem [shape: f32[2,1,32], index: 8, kind: input, shape index: {}]   ;;  %s5141_s9 = inlined_call_operand.vmem [shape: f32[2,32,128], index: 9, kind: input, shape index: {}]   ;;  %s5142_s10 = inlined_call_operand.vmem [shape: f32[2,1,128], index: 10, kind: input, shape index: {}]   ;;  %s5143_s11 = inlined_call_operand.vmem [shape: f32[2,128,32], index: 11, kind: input, shape index: {}]   ;;  %s5144_s12 = inlined_call_operand.vmem [shape: f32[2,1,32], index: 12, kind: input, shape index: {}]   ;;  %s5145_s13 = inlined_call_operand.vmem [shape: f32[1,32], index: 13, kind: input, shape index: {}]   ;;  %s5146_s14 = inlined_call_operand.vmem [shape: f32[1,32], index: 14, kind: input, shape index: {}]   ;;  %s5147_s15 = inlined_call_operand.hbm [shape: f32[2,32], index: 15, kind: output, shape index: {}]  }
   0x1   :  { %5152 = sst [smem:[#allocation10_spill]] %s5135_s3 }
   0x2   :  { %5153 = sst [smem:[#allocation11_spill]] %s5137_s5 }
   0x3   :  { %5154 = sst [smem:[#allocation12_spill]] %s5145_s13 }
   0x4   :  { %5155 = sst [smem:[#allocation13_spill]] %s5146_s14 }
   0x5   :  { %5156 = sst [smem:[#allocation14_spill]] %s5147_s15 }
   0x6   :  { %20 = vsyncpa [#allocation4], 0  ;;  %s4526_s18 = smov 0   ;;  %s4528_s19 = smov 0  }
   0x7   :  { %s4530_s20 = smov 0  }
   0x8 LB: > { %5157 = sst [smem:[#allocation6_spill]] %s4427_s19  ;;  %s35_s22 = sadd.s32 1, %s4427_s19  ;;  %s4431_s20 = sphi %s4530_s20, %s26_s20   ;;  %s4427_s19 = sphi %s4528_s19, %s5176_s19   ;;  %s4423_s18 = sphi %s4526_s18, %s5175_s18  }
   0x9   : > { %5158 = sst [smem:[#allocation7_spill]] %s4431_s20  ;;  %p36_p0 = scmp.ge.s32.totalorder %s35_s22, 2 }
   0xa   : > { %p3937_p1 = scmp.ge.s32.totalorder %s4431_s20, 1  ;;  %p554_p2 = scmp.lt.s32.totalorder %s4431_s20, 3 }
   0xb   : > { %s5178_s22 = smov (%p36_p0, %s35_s22), 0 }
   0xc   : > { %5159 = sst [smem:[#allocation8_spill]] %s5178_s22  ;;  %p555_p3 = pnand %p3937_p1, %p554_p2 }
   0xe   : > { %558 = sbr.rel (%p555_p3) target bundleno = 3703 (0xe77), region = 80 }
  0x15   : > { %p646_p4 = scmp.lt.s32.totalorder %s4423_s18, 1  ;;  %s5160_s3 = sld [smem:[#allocation10_spill]] }
  0x16   : > { %s5161_s5 = sld [smem:[#allocation11_spill]]  ;;  %p3946_p5 = scmp.ne.s32.totalorder %s4423_s18, 0 }
  0x17   : > { %s4549_s23 = scalar_select %p646_p4, %s4423_s18, 1 }
  0x18   : > { %693 = sbr.rel (%p3946_p5) target bundleno = 31 (0x1f), region = 84  ;;  %v694_v0 = vld [vmem:[%s5132_s0] sm:$0xff] (!%p3946_p5)  ;;  %vm696_vm0 = vcmask (!%p3946_p5), 261120   ;;  %v695_v1 = vld [vmem:[%s5132_s0 + $0x8] sm:$0xff] (!%p3946_p5) }
  0x19   : > { %s4008_s30 = sshll.u32 %s4549_s23, 5  ;;  %s670_s13 = scalar_lea.vmem %s5139_s7, %s4549_s23  ;;  %697 = vst.msk [vmem:[#allocation2] sm:$0xff] (!%p3946_p5), %vm696_vm0, %v694_v0  ;;  %698 = vst.msk [vmem:[#allocation2 + $0x8] sm:$0xff] (!%p3946_p5), %vm696_vm0, %v695_v1 }
  0x1a   : > { %s673_s21 = scalar_lea.vmem %s5140_s8, %s4549_s23  ;;  %s689_s16 = scalar_lea.vmem %s5144_s12, %s4549_s23 }
  0x1b   : > { %s4567_s22 = scalar_lea.vmem %s5160_s3, %s4008_s30  ;;  %s4589_s3 = scalar_lea.vmem %s5141_s9, %s4008_s30 }
  0x1c   : > { %s4572_s20 = scalar_lea.vmem %s5161_s5, %s4008_s30  ;;  %s681_s5 = scalar_lea.vmem %s5142_s10, %s4549_s23 }
  0x1d   : > { %5162 = sst [smem:[#allocation9_spill]] %s4572_s20  ;;  %s4011_s20 = sshll.u32 %s4549_s23, 7 }
  0x1e   : > { %s4599_s27 = scalar_lea.vmem %s5143_s11, %s4011_s20 }
  0x1f PF: > { %vm703_vm1 = vcmask 261120   ;;  %v747_v16 = vld [vmem:[%s4567_s22] sm:$0xff]  ;;  %v748_v17 = vld [vmem:[%s4567_s22 + $0x8] sm:$0xff]  ;;  %v749_v18 = vld [vmem:[%s4567_s22 + $0x10] sm:$0xff]  ;;  %s5164_s26 = scalar_lea.vmem %s5134_s2, %s4549_s23  ;;  %s5165_s17 = scalar_lea.vmem %s5136_s4, %s4549_s23  ;;  %v4437_v46 = vmov 0.0   ;;  %vm4438_vm2 = vmmov 0   ;;  %v839_v47 = vlaneseq }
  0x20   : > { %v699_v2 = vld [vmem:[#allocation2] sm:$0xff]  ;;  %v700_v3 = vld [vmem:[#allocation2 + $0x8] sm:$0xff]  ;;  %v4228_v19 = vpack.c.bf16 %v748_v17, %v747_v16  ;;  %v750_v20 = vld [vmem:[%s4567_s22 + $0x18] sm:$0xff]  ;;  %s5163_s22 = scalar_lea.vmem %s5133_s1, %s4549_s23  ;;  %s4433_s30 = smov 112   ;;  %4101 = vmatprep.subr.mxu0 %v4437_v46  ;;  %4103 = vmatprep.mubr.msk.f32.mxu0 %vm4438_vm2, %v4437_v46  ;;  %v4439_v48 = vmov 1983009808  }
  0x21   : > { %v704_v4 = vsel %vm703_vm1, %v699_v2, 0.0  ;;  %v707_v5 = vsel %vm703_vm1, %v700_v3, 0.0  ;;  %v4232_v21 = vpack.c.bf16 %v750_v20, %v749_v18  ;;  %v3947_v29 = vld [vmem:[%s5163_s22] ss:$0 sm:$0xff]  ;;  %s4434_s24 = smov 120   ;;  %s4435_s25 = smov 104   ;;  %v855_v49 = vunpack.c.l.s4 %v4439_v48 }
  0x22   : > { %705 = vadd.xlane.f32.xlu0 %v704_v4  ;;  %4229 = vmatprep.subr.bf16.mxu1 %v4228_v19  ;;  %v3948_v31 = vld [vmem:[%s5164_s26] ss:$0 sm:$0xff]  ;;  %s4436_s20 = smov 96   ;;  %v858_v51 = vshrl.u32 %v839_v47, 7  ;;  %v4440_v52 = vmov 1934713408  }
  0x23   : > { %4231 = vmatpush3.bf16.msra.mxu1 %v4228_v19  ;;  %v3949_v38 = vld [vmem:[%s5165_s17] ss:$0 sm:$0xff]  ;;  %v856_v50 = vunpack.c.0.s8 %v855_v49  ;;  %v887_v53 = vunpack.c.l.s4 %v4440_v52  ;;  %vm1284_vm3 = vcmask 64512   ;;  %s4441_s15 = smov 64   ;;  %s4442_s22 = smov 8   ;;  %vm2080_vm5 = vcmask 130048  }
  0x24   : > { %4233 = vmatprep.subr.bf16.mxu1 %v4232_v21  ;;  %s4443_s19 = smov 16   ;;  %s4444_s14 = smov 24   ;;  %vm2082_vm6 = vcmask 195584  }
  0x25   : > { %v4672_v56 = vsub.s32 %v856_v50, %v858_v51  ;;  %v888_v59 = vunpack.c.0.s8 %v887_v53  ;;  %s5166_s26 = sld [smem:[#allocation9_spill]]  ;;  %s5167_s17 = scalar_lea.vmem %s5138_s6, %s4549_s23 }
  0x26   : > { %708 = vadd.xlane.f32.xlu0 %v707_v5  ;;  %p4001_p6 = scmp.ne.s32.totalorder %s4423_s18, 1 }
  0x27   : > { %4235 = vmatpush3.bf16.msra.mxu1 %v4232_v21  ;;  %v4682_v1 = vsub.s32 %v888_v59, %v858_v51  ;;  %vm3718_vm9 = vcmask (!%p4001_p6), 1040384   ;;  %vm3722_vm10 = vcmask (!%p4001_p6), 254976  }
  0x28   : > { %4091 = vmatprep.subr.mxu1 %v4437_v46 }
  0xaf   : > { %v706_v6 = vpop.xlane.xlu0 %705 }
  0xb0   : > { %v711_v7 = vmul.f32 0.03125, %v706_v6 }
  0xb2   : > { %v713_v8 = vsub.f32 %v699_v2, %v711_v7 }
  0xb3   : > { %v709_v9 = vpop.xlane.xlu0 %708 }
  0xb4   : > { %v712_v10 = vmul.f32 0.03125, %v709_v9  ;;  %v715_v11 = vmul.f32 %v713_v8, %v713_v8 }
  0xb6   : > { %v714_v12 = vsub.f32 %v700_v3, %v712_v10  ;;  %v717_v13 = vsel %vm703_vm1, %v715_v11, 0.0 }
  0xb7   : > { %718 = vadd.xlane.f32.xlu1 %v717_v13 }
  0xb8   : > { %v716_v14 = vmul.f32 %v714_v12, %v714_v12 }
  0xba   : > { %v720_v15 = vsel %vm703_vm1, %v716_v14, 0.0 }
  0xbb   : > { %721 = vadd.xlane.f32.xlu1 %v720_v15 }
 0x144   : > { %v719_v22 = vpop.xlane.xlu1 %718 }
 0x145   : > { %v723_v23 = vmul.f32 0.03125, %v719_v22 }
 0x147   : > { %v725_v24 = vadd.f32 1e-06, %v723_v23 }
 0x148   : > { %v722_v25 = vpop.xlane.xlu1 %721 }
 0x149   : > { %4327 = vrsqrt.f32 %v725_v24  ;;  %v724_v26 = vmul.f32 0.03125, %v722_v25 }
 0x14b   : > { %v726_v27 = vadd.f32 1e-06, %v724_v26 }
 0x14d   : > { %4329 = vrsqrt.f32 %v726_v27 }
 0x153   : > { %v4328_v28 = vpop.eup %4327 }
 0x154   : > { %v729_v30 = vmul.f32 %v4328_v28, %v713_v8 }
 0x156   : > { %v737_v32 = vmul.f32 %v3947_v29, %v729_v30 }
 0x157   : > { %v4330_v33 = vpop.eup %4329 }
 0x158   : > { %v730_v34 = vmul.f32 %v4330_v33, %v714_v12  ;;  %v745_v35 = vadd.f32 %v3948_v31, %v737_v32 }
 0x15a   : > { %v738_v36 = vmul.f32 %v3947_v29, %v730_v34  ;;  %4088 = vmatprep.mubr.msk.f32.mxu1 %vm703_vm1, %v745_v35 }
 0x15c   : > { %v746_v37 = vadd.f32 %v3948_v31, %v738_v36 }
 0x15e   : > { %4089 = vmatmul.mubr.msk.f32.vlgmr.msra.gmra.mrb[0].mxu1 %vm703_vm1, %v746_v37 }
 0x15f   : > { %4093 = vmatprep.mubr.msk.f32.mxu1 %vm4438_vm2, %v4437_v46 }
 0x231   : > { %v4090_v39 = vpop.f32.mrb[0].mxu1 }
 0x232   : > { %v4637_v40 = vadd.f32 %v4090_v39, %v3949_v38  ;;  %v830_v41 = vpop.f32.mrb[1].mxu1 }
 0x233   : > { %v4639_v42 = vadd.f32 %v3949_v38, %v830_v41 }
 0x235   : > { %846 = vrot.lane.b32.xlu1 %v4639_v42, %s4433_s30  ;;  %843 = vrot.lane.b32.xlu0 %v4639_v42, %s4434_s24 }
 0x239   : > { %849 = vrot.lane.b32.xlu1 %v4639_v42, %s4435_s25 }
 0x23d   : > { %988 = vrot.lane.b32.xlu1 %v4639_v42, %s4436_s20 }
 0x2a7   : > { %v4649_v43 = vpop.permute.xlu1 %846  ;;  %v4651_v44 = vpop.permute.xlu0 %843 }
 0x2a8   : > { %992 = vrot.lane.b32.xlu1 %v4649_v43, %s4436_s20  ;;  %990 = vrot.lane.b32.xlu0 %v4651_v44, %s4436_s20  ;;  %v852_v57 = vcombine.low %v4639_v42, %v4649_v43  ;;  %v853_v58 = vcombine.high %v4639_v42, %v4649_v43 }
 0x2aa   : > { %v860_v63 = vrot.slane %v852_v57, %v4672_v56  ;;  %v867_v0 = vrot.slane %v853_v58, %v4672_v56 }
 0x2ab   : > { %v4657_v45 = vpop.permute.xlu1 %849 }
 0x2ac   : > { %994 = vrot.lane.b32.xlu0 %v4657_v45, %s4436_s20  ;;  %v868_v54 = vcombine.low %v4651_v44, %v4657_v45  ;;  %v869_v55 = vcombine.high %v4651_v44, %v4657_v45 }
 0x2ae   : > { %v876_v60 = vrot.slane %v868_v54, %v4672_v56  ;;  %v883_v61 = vrot.slane %v869_v55, %v4672_v56 }
 0x2af   : > { %v989_v62 = vpop.permute.xlu1 %988 }
 0x2b0   : > { %v884_v2 = vcombine.low %v860_v63, %v876_v60  ;;  %v885_v3 = vcombine.high %v860_v63, %v876_v60  ;;  %v900_v4 = vcombine.low %v867_v0, %v883_v61  ;;  %v901_v5 = vcombine.high %v867_v0, %v883_v61 }
 0x2b2   : > { %v892_v10 = vrot.slane %v884_v2, %v4682_v1  ;;  %v899_v11 = vrot.slane %v885_v3, %v4682_v1  ;;  %v908_v12 = vrot.slane %v900_v4, %v4682_v1  ;;  %v915_v13 = vrot.slane %v901_v5, %v4682_v1 }
 0x2b4   : > { %v920_v21 = vcombine.low %v892_v10, %v899_v11  ;;  %v3952_v22 = vcombine.high %v892_v10, %v899_v11  ;;  %v936_v23 = vcombine.low %v908_v12, %v915_v13  ;;  %v3953_v24 = vcombine.high %v908_v12, %v915_v13 }
 0x2b6   : > { %v927_v33 = vrot.slane %v920_v21, %v4672_v56  ;;  %v935_v34 = vrot.slane %v3952_v22, %v4672_v56  ;;  %v943_v35 = vrot.slane %v936_v23, %v4672_v56  ;;  %v951_v36 = vrot.slane %v3953_v24, %v4672_v56 }
 0x2b8   : > { %v952_v52 = vcombine.low %v927_v33, %v935_v34  ;;  %v968_v53 = vcombine.low %v943_v35, %v951_v36  ;;  %v953_v54 = vcombine.high %v927_v33, %v935_v34  ;;  %v969_v55 = vcombine.high %v943_v35, %v951_v36 }
 0x2ba   : > { %v960_v2 = vrot.slane %v952_v52, %v4682_v1  ;;  %v976_v3 = vrot.slane %v968_v53, %v4682_v1  ;;  %v967_v4 = vrot.slane %v953_v54, %v4682_v1  ;;  %v983_v5 = vrot.slane %v969_v55, %v4682_v1 }
 0x2bc   : > { %v985_v11 = vcombine.high %v960_v2, %v976_v3  ;;  %v987_v13 = vcombine.high %v967_v4, %v983_v5 }
 0x31a   : > { %v993_v6 = vpop.permute.xlu1 %992  ;;  %v991_v7 = vpop.permute.xlu0 %990 }
 0x31b   : > { %v1000_v8 = vcombine.low %v989_v62, %v993_v6  ;;  %v1001_v9 = vcombine.high %v989_v62, %v993_v6 }
 0x31d   : > { %v1008_v17 = vrot.slane %v1000_v8, %v4672_v56  ;;  %v1015_v18 = vrot.slane %v1001_v9, %v4672_v56  ;;  %v984_v8 = vcombine.low %v960_v2, %v976_v3  ;;  %v986_v9 = vcombine.low %v967_v4, %v983_v5 }
 0x31e   : > { %v995_v14 = vpop.permute.xlu0 %994 }
 0x31f   : > { %v1016_v15 = vcombine.low %v991_v7, %v995_v14  ;;  %v1017_v16 = vcombine.high %v991_v7, %v995_v14  ;;  %v4733_v14 = vand.u32 127, %v839_v47 }
 0x321   : > { %v1024_v19 = vrot.slane %v1016_v15, %v4672_v56  ;;  %v1031_v20 = vrot.slane %v1017_v16, %v4672_v56  ;;  %vm841_vm4 = vcmp.lt.s32.totalorder %v4733_v14, 5 }
 0x323   : > { %v1032_v25 = vcombine.low %v1008_v17, %v1024_v19  ;;  %v1033_v26 = vcombine.high %v1008_v17, %v1024_v19  ;;  %v1048_v27 = vcombine.low %v1015_v18, %v1031_v20  ;;  %v1049_v28 = vcombine.high %v1015_v18, %v1031_v20 }
 0x325   : > { %v1040_v29 = vrot.slane %v1032_v25, %v4682_v1  ;;  %v1047_v30 = vrot.slane %v1033_v26, %v4682_v1  ;;  %v1056_v31 = vrot.slane %v1048_v27, %v4682_v1  ;;  %v1063_v32 = vrot.slane %v1049_v28, %v4682_v1 }
 0x327   : > { %v1068_v37 = vcombine.low %v1040_v29, %v1047_v30  ;;  %v3954_v38 = vcombine.high %v1040_v29, %v1047_v30  ;;  %v1084_v39 = vcombine.low %v1056_v31, %v1063_v32  ;;  %v3955_v41 = vcombine.high %v1056_v31, %v1063_v32 }
 0x329   : > { %v1075_v48 = vrot.slane %v1068_v37, %v4672_v56  ;;  %v1083_v49 = vrot.slane %v3954_v38, %v4672_v56  ;;  %v1091_v50 = vrot.slane %v1084_v39, %v4672_v56  ;;  %v1099_v51 = vrot.slane %v3955_v41, %v4672_v56 }
 0x32b   : > { %v1100_v57 = vcombine.low %v1075_v48, %v1083_v49  ;;  %v1116_v58 = vcombine.low %v1091_v50, %v1099_v51  ;;  %v1101_v59 = vcombine.high %v1075_v48, %v1083_v49  ;;  %v1117_v60 = vcombine.high %v1091_v50, %v1099_v51 }
 0x32d   : > { %v1108_v61 = vrot.slane %v1100_v57, %v4682_v1  ;;  %v1124_v62 = vrot.slane %v1116_v58, %v4682_v1  ;;  %v1115_v63 = vrot.slane %v1101_v59, %v4682_v1  ;;  %v1131_v0 = vrot.slane %v1117_v60, %v4682_v1 }
 0x32f   : > { %v1132_v6 = vcombine.low %v1108_v61, %v1124_v62  ;;  %v1134_v7 = vcombine.low %v1115_v63, %v1131_v0  ;;  %v1133_v10 = vcombine.high %v1108_v61, %v1124_v62  ;;  %v1135_v12 = vcombine.high %v1115_v63, %v1131_v0 }
 0x331   : > { %4092 = vmatpush3.xpose.msk.msra.mxu1 %vm1284_vm3, %v1132_v6  ;;  %4102 = vmatpush3.xpose.msk.msra.mxu0 %vm1284_vm3, %v1134_v7 }
 0x332   : > { %4096 = vmatprep.subr.mxu1 %v4437_v46  ;;  %4111 = vmatprep.subr.mxu0 %v4437_v46 }
 0x334   : > { %4094 = vmatmul.mubr.msk.f32.vlgmr.msra.gmra.mrb[2].mxu1 %vm1284_vm3, %v984_v8  ;;  %4104 = vmatmul.mubr.msk.f32.vlgmr.msra.gmra.mrb[0].mxu0 %vm1284_vm3, %v986_v9 }
 0x335   : > { %4097 = vmatpush3.xpose.msk.msra.mxu1 %vm1284_vm3, %v1133_v10  ;;  %4098 = vmatprep.mubr.msk.f32.mxu1 %vm4438_vm2, %v4437_v46 }
 0x336   : > { %4106 = vmatprep.subr.mxu1 %v4437_v46  ;;  %4113 = vmatprep.mubr.msk.f32.mxu0 %vm4438_vm2, %v4437_v46 }
 0x338   : > { %4099 = vmatmul.mubr.msk.f32.vlgmr.msra.gmra.mrb[4].mxu1 %vm1284_vm3, %v985_v11 }
 0x339   : > { %4107 = vmatpush3.xpose.msk.msra.mxu1 %vm1284_vm3, %v1135_v12  ;;  %4108 = vmatprep.mubr.msk.f32.mxu1 %vm4438_vm2, %v4437_v46 }
 0x33a   : > { %4116 = vmatprep.subr.mxu1 %v4437_v46 }
 0x33c   : > { %4109 = vmatmul.mubr.msk.f32.vlgmr.msra.gmra.mrb[6].mxu1 %vm1284_vm3, %v987_v13 }
 0x33d   : > { %4118 = vmatprep.mubr.msk.f32.mxu1 %vm4438_vm2, %v4437_v46 }
 0x407   : > { %v1357_v15 = vpop.f32.mrb[2].mxu1  ;;  %v1509_v16 = vpop.f32.mrb[0].mxu0 }
 0x408   : > { %v1591_v17 = vsel %vm841_vm4, %v1357_v15, -1e+30  ;;  %v4095_v18 = vpop.f32.mrb[3].mxu1  ;;  %v4105_v19 = vpop.f32.mrb[1].mxu0  ;;  %v1593_v24 = vsel %vm841_vm4, %v1509_v16, -1e+30 }
 0x409   : > { %v1595_v20 = vsel %vm1284_vm3, %v1591_v17, -inf  ;;  %v1601_v27 = vsel %vm1284_vm3, %v1593_v24, -inf }
 0x40a   : > { %1596 = vmax.xlane.f32.xlu1 %v1595_v20 }
 0x40b   : > { %v1433_v21 = vpop.f32.mrb[4].mxu1 }
 0x40c   : > { %v1592_v22 = vsel %vm841_vm4, %v1433_v21, -1e+30  ;;  %v4100_v23 = vpop.f32.mrb[5].mxu1 }
 0x40d   : > { %v1598_v47 = vsel %vm1284_vm3, %v1592_v22, -inf }
 0x40e   : > { %1599 = vmax.xlane.f32.xlu0 %v1598_v47 }
 0x40f   : > { %v1585_v25 = vpop.f32.mrb[6].mxu1 }
 0x410   : > { %v4110_v26 = vpop.f32.mrb[7].mxu1  ;;  %v1594_v28 = vsel %vm841_vm4, %v1585_v25, -1e+30 }
 0x411   : > { %v1604_v29 = vsel %vm1284_vm3, %v1594_v28, -inf }
 0x412   : > { %1602 = vmax.xlane.f32.xlu0 %v1601_v27 }
 0x416   : > { %1605 = vmax.xlane.f32.xlu0 %v1604_v29 }
 0x41b   : > { %2085 = vrot.lane.b32.xlu1 %v4637_v40, %s4434_s24 }
 0x41f   : > { %2091 = vrot.lane.b32.xlu1 %v4637_v40, %s4435_s25 }
 0x423   : > { %1138 = vrot.lane.b32.xlu1 %v4651_v44, %s4441_s15 }
 0x427   : > { %1140 = vrot.lane.b32.xlu1 %v4649_v43, %s4441_s15 }
 0x42b   : > { %1142 = vrot.lane.b32.xlu1 %v4657_v45, %s4441_s15 }
 0x42c   : > { %2088 = vrot.lane.b32.xlu0 %v4637_v40, %s4433_s30 }
 0x430   : > { %1136 = vrot.lane.b32.xlu0 %v4639_v42, %s4441_s15 }
 0x434   : > { %2230 = vrot.lane.b32.xlu0 %v4637_v40, %s4436_s20 }
 0x497   : > { %v1597_v30 = vpop.xlane.xlu1 %1596 }
 0x498   : > { %v1607_v39 = vsub.f32 %v1591_v17, %v1597_v30 }
 0x49a   : > { %v1611_v53 = vmul.f32 1.442695, %v1607_v39 }
 0x49b   : > { %v4764_v31 = vpop.permute.xlu1 %2085  ;;  %v1600_v32 = vpop.xlane.xlu0 %1599 }
 0x49c   : > { %2232 = vrot.lane.b32.xlu1 %v4764_v31, %s4436_s20  ;;  %v1608_v33 = vsub.f32 %v1592_v22, %v1600_v32 }
 0x49e   : > { %v1613_v37 = vmul.f32 1.442695, %v1608_v33 }
 0x49f   : > { %v4768_v43 = vpop.permute.xlu1 %2091  ;;  %v1603_v44 = vpop.xlane.xlu0 %1602 }
 0x4a0   : > { %v1609_v45 = vsub.f32 %v1593_v24, %v1603_v44  ;;  %v2111_v39 = vcombine.high %v4764_v31, %v4768_v43 }
 0x4a2   : > { %v1615_v34 = vmul.f32 1.442695, %v1609_v45 }
 0x4a3   : > { %v1139_v35 = vpop.permute.xlu1 %1138  ;;  %v1606_v36 = vpop.xlane.xlu0 %1605 }
 0x4a4   : > { %4331 = vpow2.f32 %v1615_v34  ;;  %v1610_v54 = vsub.f32 %v1594_v28, %v1606_v36 }
 0x4a5   : > { %4333 = vpow2.f32 %v1613_v37 }
 0x4a6   : > { %4335 = vpow2.f32 %v1611_v53  ;;  %v1617_v2 = vmul.f32 1.442695, %v1610_v54 }
 0x4a7   : > { %v1141_v42 = vpop.permute.xlu1 %1140  ;;  %v4770_v38 = vpop.permute.xlu0 %2088 }
 0x4a8   : > { %4337 = vpow2.f32 %v1617_v2  ;;  %v2094_v36 = vcombine.low %v4637_v40, %v4770_v38  ;;  %v2095_v37 = vcombine.high %v4637_v40, %v4770_v38 }
 0x4ab   : > { %v1143_v41 = vpop.permute.xlu1 %1142  ;;  %v1137_v48 = vpop.permute.xlu0 %1136 }
 0x4ac   : > { %v1164_v49 = vcombine.low %v1139_v35, %v1143_v41  ;;  %v1165_v50 = vcombine.high %v1139_v35, %v1143_v41  ;;  %v1148_v51 = vcombine.low %v1137_v48, %v1141_v42  ;;  %v1149_v52 = vcombine.high %v1137_v48, %v1141_v42 }
 0x4ad   : > { %v2110_v42 = vcombine.low %v4764_v31, %v4768_v43  ;;  %v2102_v48 = vrot.slane %v2094_v36, %v4672_v56 }
 0x4ae   : > { %v1172_v55 = vrot.slane %v1164_v49, %v4672_v56  ;;  %v1179_v57 = vrot.slane %v1165_v50, %v4672_v56  ;;  %v1156_v58 = vrot.slane %v1148_v51, %v4672_v56  ;;  %v1163_v59 = vrot.slane %v1149_v52, %v4672_v56  ;;  %v4776_v60 = vpop.eup %4331 }
 0x4af   : > { %v1625_v7 = vsel %vm1284_vm3, %v4776_v60, 0.0  ;;  %v4334_v8 = vpop.eup %4333  ;;  %v2231_v33 = vpop.permute.xlu0 %2230  ;;  %v2109_v49 = vrot.slane %v2095_v37, %v4672_v56  ;;  %v2118_v50 = vrot.slane %v2110_v42, %v4672_v56  ;;  %v2125_v51 = vrot.slane %v2111_v39, %v4672_v56 }
 0x4b0   : > { %v1180_v61 = vcombine.low %v1156_v58, %v1172_v55  ;;  %v1181_v62 = vcombine.high %v1156_v58, %v1172_v55  ;;  %v1196_v63 = vcombine.low %v1163_v59, %v1179_v57  ;;  %v1197_v0 = vcombine.high %v1163_v59, %v1179_v57  ;;  %1626 = vadd.xlane.f32.xlu0 %v1625_v7  ;;  %v4797_v26 = vpop.eup %4335 }
 0x4b1   : > { %v1622_v18 = vsel %vm1284_vm3, %v4334_v8, 0.0  ;;  %v1619_v32 = vsel %vm1284_vm3, %v4797_v26, 0.0  ;;  %v2126_v53 = vcombine.low %v2102_v48, %v2118_v50  ;;  %v2127_v54 = vcombine.high %v2102_v48, %v2118_v50 }
 0x4b2   : > { %v1188_v3 = vrot.slane %v1180_v61, %v4682_v1  ;;  %v1195_v4 = vrot.slane %v1181_v62, %v4682_v1  ;;  %v1204_v5 = vrot.slane %v1196_v63, %v4682_v1  ;;  %v1211_v6 = vrot.slane %v1197_v0, %v4682_v1  ;;  %v4805_v44 = vpop.eup %4337 }
 0x4b3   : > { %v1628_v45 = vsel %vm1284_vm3, %v4805_v44, 0.0  ;;  %v2142_v55 = vcombine.low %v2109_v49, %v2125_v51  ;;  %v2143_v57 = vcombine.high %v2109_v49, %v2125_v51  ;;  %v2134_v63 = vrot.slane %v2126_v53, %v4682_v1 }
 0x4b4   : > { %v1216_v9 = vcombine.low %v1188_v3, %v1195_v4  ;;  %v3956_v10 = vcombine.high %v1188_v3, %v1195_v4  ;;  %v1232_v11 = vcombine.low %v1204_v5, %v1211_v6  ;;  %v3957_v12 = vcombine.high %v1204_v5, %v1211_v6  ;;  %1623 = vadd.xlane.f32.xlu0 %v1622_v18 }
 0x4b5   : > { %v2141_v0 = vrot.slane %v2127_v54, %v4682_v1  ;;  %v2150_v2 = vrot.slane %v2142_v55, %v4682_v1  ;;  %v2157_v3 = vrot.slane %v2143_v57, %v4682_v1 }
 0x4b6   : > { %v1223_v13 = vrot.slane %v1216_v9, %v4672_v56  ;;  %v1231_v15 = vrot.slane %v3956_v10, %v4672_v56  ;;  %v1239_v16 = vrot.slane %v1232_v11, %v4672_v56  ;;  %v1247_v17 = vrot.slane %v3957_v12, %v4672_v56 }
 0x4b7   : > { %v2162_v9 = vcombine.low %v2134_v63, %v2141_v0  ;;  %v3972_v10 = vcombine.high %v2134_v63, %v2141_v0  ;;  %v2178_v11 = vcombine.low %v2150_v2, %v2157_v3  ;;  %v3973_v12 = vcombine.high %v2150_v2, %v2157_v3 }
 0x4b8   : > { %v1248_v19 = vcombine.low %v1223_v13, %v1231_v15  ;;  %v1264_v20 = vcombine.low %v1239_v16, %v1247_v17  ;;  %v1249_v21 = vcombine.high %v1223_v13, %v1231_v15  ;;  %v1265_v22 = vcombine.high %v1239_v16, %v1247_v17 }
 0x4ba   : > { %v1256_v23 = vrot.slane %v1248_v19, %v4682_v1  ;;  %v1272_v47 = vrot.slane %v1264_v20, %v4682_v1  ;;  %v4792_v24 = vrot.slane %v1249_v21, %v4682_v1  ;;  %v4795_v25 = vrot.slane %v1265_v22, %v4682_v1 }
 0x4bc   : > { %v1280_v27 = vcombine.low %v1256_v23, %v1272_v47  ;;  %v1281_v28 = vcombine.high %v1256_v23, %v1272_v47  ;;  %v1283_v29 = vcombine.high %v4792_v24, %v4795_v25  ;;  %v1282_v30 = vcombine.low %v4792_v24, %v4795_v25 }
 0x4be   : > { %4112 = vmatpush3.msra.mxu0 %v1280_v27  ;;  %4117 = vmatpush3.msra.mxu1 %v1281_v28  ;;  %v2169_v27 = vrot.slane %v2162_v9, %v4672_v56  ;;  %v2177_v28 = vrot.slane %v3972_v10, %v4672_v56 }
 0x4bf   : > { %4126 = vmatprep.subr.mxu1 %v4437_v46  ;;  %4121 = vmatprep.subr.mxu0 %v4437_v46 }
 0x4c0   : > { %1620 = vadd.xlane.f32.xlu1 %v1619_v32  ;;  %v2193_v32 = vrot.slane %v3973_v12, %v4672_v56  ;;  %v2194_v49 = vcombine.low %v2169_v27, %v2177_v28 }
 0x4c2   : > { %v2202_v57 = vrot.slane %v2194_v49, %v4682_v1 }
 0x4c4   : > { %1629 = vadd.xlane.f32.xlu1 %v1628_v45 }
 0x4ca   : > { %2234 = vrot.lane.b32.xlu0 %v4770_v38, %s4436_s20 }
 0x4d5   : > { %2236 = vrot.lane.b32.xlu1 %v4768_v43, %s4436_s20 }
 0x50e   : > { %v2233_v41 = vpop.permute.xlu1 %2232 }
 0x53d   : > { %v1627_v34 = vpop.xlane.xlu0 %1626 }
 0x541   : > { %v1624_v35 = vpop.xlane.xlu0 %1623 }
 0x542   : > { %4339 = vrcp.f32 %v1624_v35 }
 0x545   : > { %v2235_v59 = vpop.permute.xlu0 %2234 }
 0x546   : > { %v2242_v4 = vcombine.low %v2231_v33, %v2235_v59  ;;  %v2243_v5 = vcombine.high %v2231_v33, %v2235_v59  ;;  %v2195_v59 = vcombine.high %v2169_v27, %v2177_v28 }
 0x548   : > { %v2250_v15 = vrot.slane %v2242_v4, %v4672_v56  ;;  %v2257_v16 = vrot.slane %v2243_v5, %v4672_v56  ;;  %v2209_v5 = vrot.slane %v2195_v59, %v4682_v1 }
 0x54c   : > { %v4340_v58 = vpop.eup %4339 }
 0x54d   : > { %v1621_v52 = vpop.xlane.xlu1 %1620  ;;  %v1634_v62 = vmul.f32 %v4340_v58, %v4334_v8 }
 0x54e   : > { %4341 = vrcp.f32 %v1621_v52 }
 0x54f   : > { %4343 = vrcp.f32 %v1627_v34  ;;  %4119 = vmatmul.mubr.msk.f32.vlgmr.msra.gmra.mrb[8].mxu1 %vm1284_vm3, %v1634_v62 }
 0x550   : > { %4127 = vmatpush3.msra.mxu1 %v1283_v29  ;;  %4128 = vmatprep.mubr.msk.f32.mxu1 %vm4438_vm2, %v4437_v46  ;;  %v2185_v29 = vrot.slane %v2178_v11, %v4672_v56 }
 0x551   : > { %v1630_v61 = vpop.xlane.xlu1 %1629  ;;  %4136 = vmatprep.subr.mxu1 %v4437_v46 }
 0x552   : > { %4345 = vrcp.f32 %v1630_v61  ;;  %v2210_v24 = vcombine.low %v2185_v29, %v2193_v32  ;;  %v2211_v61 = vcombine.high %v2185_v29, %v2193_v32 }
 0x554   : > { %v2218_v58 = vrot.slane %v2210_v24, %v4682_v1 }
 0x555   : > { %v2237_v6 = vpop.permute.xlu1 %2236 }
 0x556   : > { %v2258_v7 = vcombine.low %v2233_v41, %v2237_v6  ;;  %v2259_v8 = vcombine.high %v2233_v41, %v2237_v6  ;;  %v2226_v3 = vcombine.low %v2202_v57, %v2218_v58  ;;  %v2227_v4 = vcombine.high %v2202_v57, %v2218_v58 }
 0x557   : > { %v2225_v6 = vrot.slane %v2211_v61, %v4682_v1 }
 0x558   : > { %v4342_v13 = vpop.eup %4341  ;;  %v2266_v17 = vrot.slane %v2258_v7, %v4672_v56  ;;  %v2273_v18 = vrot.slane %v2259_v8, %v4672_v56 }
 0x559   : > { %v1632_v19 = vmul.f32 %v4342_v13, %v4797_v26  ;;  %v4344_v20 = vpop.eup %4343  ;;  %v2228_v9 = vcombine.low %v2209_v5, %v2225_v6  ;;  %v2229_v10 = vcombine.high %v2209_v5, %v2225_v6 }
 0x55a   : > { %v2274_v21 = vcombine.low %v2250_v15, %v2266_v17  ;;  %v2275_v22 = vcombine.high %v2250_v15, %v2266_v17  ;;  %v2290_v23 = vcombine.low %v2257_v16, %v2273_v18  ;;  %v2291_v47 = vcombine.high %v2257_v16, %v2273_v18 }
 0x55b   : > { %4114 = vmatmul.mubr.msk.f32.vlgmr.msra.gmra.mrb[2].mxu0 %vm1284_vm3, %v1632_v19  ;;  %v1636_v36 = vmul.f32 %v4344_v20, %v4776_v60 }
 0x55c   : > { %v4346_v45 = vpop.eup %4345  ;;  %v2282_v33 = vrot.slane %v2274_v21, %v4682_v1  ;;  %v2289_v26 = vrot.slane %v2275_v22, %v4682_v1  ;;  %v2298_v34 = vrot.slane %v2290_v23, %v4682_v1  ;;  %v2305_v35 = vrot.slane %v2291_v47, %v4682_v1  ;;  %4122 = vmatpush3.msra.mxu0 %v1282_v30 }
 0x55d   : > { %v1638_v37 = vmul.f32 %v4346_v45, %v4805_v44  ;;  %4123 = vmatprep.mubr.msk.f32.mxu0 %vm4438_vm2, %v4437_v46  ;;  %4131 = vmatprep.subr.mxu0 %v4437_v46 }
 0x55e   : > { %v2310_v42 = vcombine.low %v2282_v33, %v2289_v26  ;;  %v3974_v39 = vcombine.high %v2282_v33, %v2289_v26  ;;  %v2326_v41 = vcombine.low %v2298_v34, %v2305_v35  ;;  %v3975_v48 = vcombine.high %v2298_v34, %v2305_v35 }
 0x55f   : > { %4124 = vmatmul.mubr.msk.f32.vlgmr.msra.gmra.mrb[4].mxu0 %vm1284_vm3, %v1636_v36  ;;  %4129 = vmatmul.mubr.msk.f32.vlgmr.msra.gmra.mrb[10].mxu1 %vm1284_vm3, %v1638_v37 }
 0x560   : > { %v2317_v25 = vrot.slane %v2310_v42, %v4672_v56  ;;  %v2325_v60 = vrot.slane %v3974_v39, %v4672_v56  ;;  %v2333_v30 = vrot.slane %v2326_v41, %v4672_v56  ;;  %v2341_v44 = vrot.slane %v3975_v48, %v4672_v56  ;;  %4133 = vmatprep.mubr.msk.f32.mxu0 %vm4438_vm2, %v4437_v46 }
 0x561   : > { %4138 = vmatprep.mubr.msk.f32.mxu1 %vm4438_vm2, %v4437_v46 }
 0x562   : > { %v2342_v50 = vcombine.low %v2317_v25, %v2325_v60  ;;  %v2343_v51 = vcombine.high %v2317_v25, %v2325_v60  ;;  %v2358_v52 = vcombine.low %v2333_v30, %v2341_v44  ;;  %v2359_v53 = vcombine.high %v2333_v30, %v2341_v44 }
 0x564   : > { %v2350_v54 = vrot.slane %v2342_v50, %v4682_v1  ;;  %v2366_v55 = vrot.slane %v2358_v52, %v4682_v1  ;;  %v2357_v0 = vrot.slane %v2343_v51, %v4682_v1  ;;  %v2373_v2 = vrot.slane %v2359_v53, %v4682_v1 }
 0x566   : > { %v2374_v62 = vcombine.low %v2350_v54, %v2366_v55  ;;  %v2375_v63 = vcombine.high %v2350_v54, %v2366_v55  ;;  %v2376_v7 = vcombine.low %v2357_v0, %v2373_v2  ;;  %v2377_v8 = vcombine.high %v2357_v0, %v2373_v2 }
 0x568   : > { %4132 = vmatpush3.xpose.msk.msra.mxu0 %vm1284_vm3, %v2374_v62  ;;  %4137 = vmatpush3.xpose.msk.msra.mxu1 %vm1284_vm3, %v2375_v63 }
 0x569   : > { %4141 = vmatprep.subr.mxu0 %v4437_v46  ;;  %4146 = vmatprep.subr.mxu1 %v4437_v46 }
 0x56b   : > { %4134 = vmatmul.mubr.msk.f32.vlgmr.msra.gmra.mrb[6].mxu0 %vm1284_vm3, %v2226_v3  ;;  %4139 = vmatmul.mubr.msk.f32.vlgmr.msra.gmra.mrb[12].mxu1 %vm1284_vm3, %v2227_v4 }
 0x56c   : > { %4142 = vmatpush3.xpose.msk.msra.mxu0 %vm1284_vm3, %v2376_v7  ;;  %4147 = vmatpush3.xpose.msk.msra.mxu1 %vm1284_vm3, %v2377_v8 }
 0x56d   : > { %4143 = vmatprep.mubr.msk.f32.mxu0 %vm4438_vm2, %v4437_v46  ;;  %4148 = vmatprep.mubr.msk.f32.mxu1 %vm4438_vm2, %v4437_v46 }
 0x56e   : > { %4151 = vmatprep.subr.mxu0 %v4437_v46  ;;  %4156 = vmatprep.subr.mxu1 %v4437_v46 }
 0x56f   : > { %4144 = vmatmul.mubr.msk.f32.vlgmr.msra.gmra.mrb[8].mxu0 %vm1284_vm3, %v2228_v9  ;;  %4149 = vmatmul.mubr.msk.f32.vlgmr.msra.gmra.mrb[14].mxu1 %vm1284_vm3, %v2229_v10 }
 0x570   : > { %4153 = vmatprep.mubr.msk.f32.mxu0 %vm4438_vm2, %v4437_v46  ;;  %4158 = vmatprep.mubr.msk.f32.mxu1 %vm4438_vm2, %v4437_v46 }
 0x622   : > { %v1781_v11 = vpop.f32.mrb[8].mxu1 }
 0x623   : > { %v4120_v12 = vpop.f32.mrb[9].mxu1 }
 0x62e   : > { %v1708_v13 = vpop.f32.mrb[2].mxu0 }
 0x62f   : > { %v4115_v15 = vpop.f32.mrb[3].mxu0 }
 0x632   : > { %v1854_v16 = vpop.f32.mrb[4].mxu0  ;;  %v1927_v17 = vpop.f32.mrb[10].mxu1 }
 0x633   : > { %v1931_v18 = vcombine.low %v1708_v13, %v1854_v16  ;;  %v1932_v19 = vcombine.high %v1708_v13, %v1854_v16  ;;  %v1947_v20 = vcombine.low %v1781_v11, %v1927_v17  ;;  %v1948_v21 = vcombine.high %v1781_v11, %v1927_v17  ;;  %v4125_v22 = vpop.f32.mrb[5].mxu0  ;;  %v4130_v23 = vpop.f32.mrb[11].mxu1 }
 0x635   : > { %v1939_v47 = vrot.slane %v1931_v18, %v4672_v56  ;;  %v1946_v27 = vrot.slane %v1932_v19, %v4672_v56  ;;  %v1955_v28 = vrot.slane %v1947_v20, %v4672_v56  ;;  %v1962_v29 = vrot.slane %v1948_v21, %v4672_v56 }
 0x637   : > { %v1963_v32 = vcombine.low %v1939_v47, %v1955_v28  ;;  %v1964_v45 = vcombine.high %v1939_v47, %v1955_v28  ;;  %v1979_v33 = vcombine.low %v1946_v27, %v1962_v29  ;;  %v1980_v26 = vcombine.high %v1946_v27, %v1962_v29 }
 0x639   : > { %v1971_v34 = vrot.slane %v1963_v32, %v4682_v1  ;;  %v1978_v35 = vrot.slane %v1964_v45, %v4682_v1  ;;  %v1987_v36 = vrot.slane %v1979_v33, %v4682_v1  ;;  %v1994_v37 = vrot.slane %v1980_v26, %v4682_v1 }
 0x63b   : > { %v1999_v42 = vcombine.low %v1971_v34, %v1978_v35  ;;  %v3970_v39 = vcombine.high %v1971_v34, %v1978_v35  ;;  %v2015_v41 = vcombine.low %v1987_v36, %v1994_v37  ;;  %v3971_v48 = vcombine.high %v1987_v36, %v1994_v37 }
 0x63d   : > { %v2006_v49 = vrot.slane %v1999_v42, %v4672_v56  ;;  %v2014_v24 = vrot.slane %v3970_v39, %v4672_v56  ;;  %v2022_v25 = vrot.slane %v2015_v41, %v4672_v56  ;;  %v2030_v60 = vrot.slane %v3971_v48, %v4672_v56 }
 0x63e   : > { %v2598_v30 = vpop.f32.mrb[6].mxu0  ;;  %v2674_v44 = vpop.f32.mrb[12].mxu1 }
 0x63f   : > { %v2830_v50 = vsel %vm841_vm4, %v2598_v30, -1e+30  ;;  %v2831_v51 = vsel %vm841_vm4, %v2674_v44, -1e+30  ;;  %v4135_v52 = vpop.f32.mrb[7].mxu0  ;;  %v4140_v53 = vpop.f32.mrb[13].mxu1  ;;  %v2031_v54 = vcombine.low %v2006_v49, %v2014_v24  ;;  %v2047_v55 = vcombine.low %v2022_v25, %v2030_v60 }
 0x640   : > { %v2834_v57 = vsel %vm1284_vm3, %v2830_v50, -inf  ;;  %v2837_v58 = vsel %vm1284_vm3, %v2831_v51, -inf  ;;  %v2032_v59 = vcombine.high %v2006_v49, %v2014_v24  ;;  %v2048_v61 = vcombine.high %v2022_v25, %v2030_v60 }
 0x641   : > { %2835 = vmax.xlane.f32.xlu0 %v2834_v57  ;;  %2838 = vmax.xlane.f32.xlu1 %v2837_v58  ;;  %v4914_v62 = vrot.slane %v2031_v54, %v4682_v1  ;;  %v4917_v63 = vrot.slane %v2047_v55, %v4682_v1 }
 0x642   : > { %v2750_v0 = vpop.f32.mrb[8].mxu0  ;;  %v2826_v2 = vpop.f32.mrb[14].mxu1  ;;  %v2046_v3 = vrot.slane %v2032_v59, %v4682_v1  ;;  %v2062_v4 = vrot.slane %v2048_v61, %v4682_v1 }
 0x643   : > { %v2832_v5 = vsel %vm841_vm4, %v2750_v0, -1e+30  ;;  %v4145_v6 = vpop.f32.mrb[9].mxu0  ;;  %v4150_v7 = vpop.f32.mrb[15].mxu1  ;;  %v2064_v8 = vcombine.high %v4914_v62, %v4917_v63  ;;  %v2063_v9 = vcombine.low %v4914_v62, %v4917_v63  ;;  %v2833_v13 = vsel %vm841_vm4, %v2826_v2, -1e+30 }
 0x644   : > { %v2840_v10 = vsel %vm1284_vm3, %v2832_v5, -inf  ;;  %v2065_v11 = vcombine.low %v2046_v3, %v2062_v4  ;;  %v2066_v12 = vcombine.high %v2046_v3, %v2062_v4  ;;  %v2843_v15 = vsel %vm1284_vm3, %v2833_v13, -inf  ;;  %v3321_v62 = vld [vmem:[%s5166_s26] sm:$0xff]  ;;  %v3322_v63 = vld [vmem:[%s5166_s26 + $0x8] sm:$0xff] }
 0x645   : > { %2841 = vmax.xlane.f32.xlu0 %v2840_v10 }
 0x649   : > { %2844 = vmax.xlane.f32.xlu0 %v2843_v15 }
 0x6ce   : > { %v2836_v16 = vpop.xlane.xlu0 %2835  ;;  %v2839_v17 = vpop.xlane.xlu1 %2838 }
 0x6cf   : > { %v2846_v18 = vsub.f32 %v2830_v50, %v2836_v16  ;;  %v2847_v19 = vsub.f32 %v2831_v51, %v2839_v17 }
 0x6d1   : > { %v2850_v20 = vmul.f32 1.442695, %v2846_v18  ;;  %v2852_v21 = vmul.f32 1.442695, %v2847_v19 }
 0x6d2   : > { %v2842_v22 = vpop.xlane.xlu0 %2841 }
 0x6d3   : > { %4347 = vpow2.f32 %v2850_v20  ;;  %v2848_v23 = vsub.f32 %v2832_v5, %v2842_v22 }
 0x6d4   : > { %4349 = vpow2.f32 %v2852_v21 }
 0x6d5   : > { %v2854_v47 = vmul.f32 1.442695, %v2848_v23 }
 0x6d6   : > { %v2845_v33 = vpop.xlane.xlu0 %2844 }
 0x6d7   : > { %4351 = vpow2.f32 %v2854_v47  ;;  %v2849_v26 = vsub.f32 %v2833_v13, %v2845_v33 }
 0x6d9   : > { %v2856_v34 = vmul.f32 1.442695, %v2849_v26 }
 0x6db   : > { %4353 = vpow2.f32 %v2856_v34 }
 0x6dd   : > { %v4931_v27 = vpop.eup %4347 }
 0x6de   : > { %v4933_v14 = vpop.eup %4349  ;;  %v2858_v28 = vsel %vm1284_vm3, %v4931_v27, 0.0 }
 0x6df   : > { %v2861_v29 = vsel %vm1284_vm3, %v4933_v14, 0.0  ;;  %2859 = vadd.xlane.f32.xlu0 %v2858_v28 }
 0x6e0   : > { %2862 = vadd.xlane.f32.xlu1 %v2861_v29 }
 0x6e1   : > { %v4939_v32 = vpop.eup %4351 }
 0x6e2   : > { %v2864_v45 = vsel %vm1284_vm3, %v4939_v32, 0.0 }
 0x6e3   : > { %2865 = vadd.xlane.f32.xlu0 %v2864_v45 }
 0x6e5   : > { %v4950_v35 = vpop.eup %4353 }
 0x6e6   : > { %v2867_v36 = vsel %vm1284_vm3, %v4950_v35, 0.0 }
 0x6f1   : > { %2380 = vrot.lane.b32.xlu1 %v4764_v31, %s4441_s15 }
 0x6f5   : > { %2382 = vrot.lane.b32.xlu1 %v4770_v38, %s4441_s15 }
 0x6f9   : > { %2378 = vrot.lane.b32.xlu0 %v4637_v40, %s4441_s15 }
 0x6fd   : > { %2068 = vrot.lane.b32.xlu0 %v2064_v8, %s4442_s22 }
 0x719   : > { %2868 = vadd.xlane.f32.xlu1 %v2867_v36 }
 0x72a   : > { %2384 = vrot.lane.b32.xlu1 %v4768_v43, %s4441_s15 }
 0x72e   : > { %2072 = vrot.lane.b32.xlu1 %v2065_v11, %s4443_s19 }
 0x732   : > { %2076 = vrot.lane.b32.xlu1 %v2066_v12, %s4444_s14 }
 0x76c   : > { %v2860_v31 = vpop.xlane.xlu0 %2859 }
 0x76d   : > { %v2863_v40 = vpop.xlane.xlu1 %2862  ;;  %4355 = vrcp.f32 %v2860_v31 }
 0x76e   : > { %4357 = vrcp.f32 %v2863_v40 }
 0x770   : > { %v2866_v37 = vpop.xlane.xlu0 %2865 }
 0x771   : > { %v2381_v38 = vpop.permute.xlu1 %2380  ;;  %4359 = vrcp.f32 %v2866_v37 }
 0x774   : > { %v2379_v39 = vpop.permute.xlu0 %2378 }
 0x775   : > { %v2383_v42 = vpop.permute.xlu1 %2382 }
 0x776   : > { %v2390_v48 = vcombine.low %v2379_v39, %v2383_v42  ;;  %v2391_v49 = vcombine.high %v2379_v39, %v2383_v42 }
 0x777   : > { %v4356_v8 = vpop.eup %4355 }
 0x778   : > { %v2398_v43 = vrot.slane %v2390_v48, %v4672_v56  ;;  %v2405_v30 = vrot.slane %v2391_v49, %v4672_v56  ;;  %v4358_v15 = vpop.eup %4357  ;;  %v2871_v29 = vmul.f32 %v4356_v8, %v4931_v27  ;;  %v2069_v45 = vpop.permute.xlu0 %2068 }
 0x779   : > { %v2873_v28 = vmul.f32 %v4358_v15, %v4933_v14  ;;  %v2079_v14 = vsel %vm1284_vm3, %v2063_v9, %v2069_v45  ;;  %v4236_v9 = vpack.c.bf16 %v3322_v63, %v3321_v62 }
 0x77b   : > { %v4360_v19 = vpop.eup %4359 }
 0x77c   : > { %v2875_v27 = vmul.f32 %v4360_v19, %v4939_v32 }
 0x7a6   : > { %v2869_v41 = vpop.xlane.xlu1 %2868 }
 0x7a7   : > { %4361 = vrcp.f32 %v2869_v41 }
 0x7aa   : > { %v2385_v24 = vpop.permute.xlu1 %2384 }
 0x7ab   : > { %v2406_v25 = vcombine.low %v2381_v38, %v2385_v24  ;;  %v2407_v60 = vcombine.high %v2381_v38, %v2385_v24 }
 0x7ad   : > { %v2414_v44 = vrot.slane %v2406_v25, %v4672_v56  ;;  %v2421_v50 = vrot.slane %v2407_v60, %v4672_v56 }
 0x7ae   : > { %v2073_v16 = vpop.permute.xlu1 %2072 }
 0x7af   : > { %v2422_v51 = vcombine.low %v2398_v43, %v2414_v44  ;;  %v2423_v52 = vcombine.high %v2398_v43, %v2414_v44  ;;  %v2438_v53 = vcombine.low %v2405_v30, %v2421_v50  ;;  %v2439_v54 = vcombine.high %v2405_v30, %v2421_v50 }
 0x7b0   : > { %v2081_v40 = vsel %vm2080_vm5, %v2079_v14, %v2073_v16 }
 0x7b1   : > { %v2430_v55 = vrot.slane %v2422_v51, %v4682_v1  ;;  %v2437_v57 = vrot.slane %v2423_v52, %v4682_v1  ;;  %v2446_v58 = vrot.slane %v2438_v53, %v4682_v1  ;;  %v2453_v59 = vrot.slane %v2439_v54, %v4682_v1  ;;  %v4362_v47 = vpop.eup %4361  ;;  %v3323_v54 = vld [vmem:[%s5166_s26 + $0x10] sm:$0xff] }
 0x7b2   : > { %v2077_v34 = vpop.permute.xlu1 %2076  ;;  %v2877_v36 = vmul.f32 %v4362_v47, %v4950_v35 }
 0x7b3   : > { %v2458_v61 = vcombine.low %v2430_v55, %v2437_v57  ;;  %v3976_v0 = vcombine.high %v2430_v55, %v2437_v57  ;;  %v2474_v2 = vcombine.low %v2446_v58, %v2453_v59  ;;  %v3977_v3 = vcombine.high %v2446_v58, %v2453_v59  ;;  %v3324_v55 = vld [vmem:[%s5166_s26 + $0x18] sm:$0xff] }
 0x7b4   : > { %v2083_v31 = vsel %vm2082_vm6, %v2081_v40, %v2077_v34  ;;  %v4375_v34 = vld [vmem:[#allocation2 + $0x8] sm:$0xff] }
 0x7b5   : > { %v2465_v4 = vrot.slane %v2458_v61, %v4672_v56  ;;  %v2473_v5 = vrot.slane %v3976_v0, %v4672_v56  ;;  %v2481_v6 = vrot.slane %v2474_v2, %v4672_v56  ;;  %v2489_v7 = vrot.slane %v3977_v3, %v4672_v56 }
 0x7b6   : > { %v4240_v0 = vpack.c.bf16 %v3324_v55, %v3323_v54 }
 0x7b7   : > { %v2490_v10 = vcombine.low %v2465_v4, %v2473_v5  ;;  %v2506_v11 = vcombine.low %v2481_v6, %v2489_v7  ;;  %v2491_v12 = vcombine.high %v2465_v4, %v2473_v5  ;;  %v2507_v13 = vcombine.high %v2481_v6, %v2489_v7 }
 0x7b9   : > { %v2498_v17 = vrot.slane %v2490_v10, %v4682_v1  ;;  %v2514_v18 = vrot.slane %v2506_v11, %v4682_v1  ;;  %v2505_v20 = vrot.slane %v2491_v12, %v4682_v1  ;;  %v2521_v21 = vrot.slane %v2507_v13, %v4682_v1 }
 0x7bb   : > { %v2522_v22 = vcombine.low %v2498_v17, %v2514_v18  ;;  %v2523_v23 = vcombine.high %v2498_v17, %v2514_v18  ;;  %v2524_v33 = vcombine.low %v2505_v20, %v2521_v21  ;;  %v2525_v26 = vcombine.high %v2505_v20, %v2521_v21 }
 0x7bd   : > { %4152 = vmatpush3.msra.mxu0 %v2522_v22  ;;  %4157 = vmatpush3.msra.mxu1 %v2523_v23 }
 0x7be   : > { %4154 = vmatmul.mubr.msk.f32.vlgmr.msra.gmra.mrb[10].mxu0 %vm1284_vm3, %v2871_v29  ;;  %4159 = vmatmul.mubr.msk.f32.vlgmr.msra.gmra.mrb[16].mxu1 %vm1284_vm3, %v2873_v28 }
 0x7bf   : > { %4161 = vmatprep.subr.mxu0 %v4437_v46  ;;  %4166 = vmatprep.subr.mxu1 %v4437_v46 }
 0x7c0   : > { %4162 = vmatpush3.msra.mxu0 %v2524_v33  ;;  %4167 = vmatpush3.msra.mxu1 %v2525_v26  ;;  %v3994_v26 = vld [vmem:[%s5167_s17] ss:$0 sm:$0xff] }
 0x7c1   : > { %4163 = vmatprep.mubr.msk.f32.mxu0 %vm4438_vm2, %v4437_v46  ;;  %4168 = vmatprep.mubr.msk.f32.mxu1 %vm4438_vm2, %v4437_v46 }
 0x7c2   : > { %4164 = vmatmul.mubr.msk.f32.vlgmr.msra.gmra.mrb[12].mxu0 %vm1284_vm3, %v2875_v27  ;;  %4169 = vmatmul.mubr.msk.f32.vlgmr.msra.gmra.mrb[18].mxu1 %vm1284_vm3, %v2877_v36  ;;  %v4376_v36 = vld [vmem:[#allocation2] sm:$0xff] }
 0x7c3   : > { %4179 = vmatprep.mubr.msk.f32.mxu1 %vm703_vm1, %v2083_v31  ;;  %4237 = vmatprep.subr.bf16.mxu1 %v4236_v9 }
 0x7c4   : > { %4239 = vmatpush3.bf16.msra.mxu1 %v4236_v9 }
 0x7c5   : > { %4241 = vmatprep.subr.bf16.mxu1 %v4240_v0 }
 0x7c8   : > { %4243 = vmatpush3.bf16.msra.mxu1 %v4240_v0 }
 0x891   : > { %v2947_v32 = vpop.f32.mrb[10].mxu0  ;;  %v3020_v35 = vpop.f32.mrb[16].mxu1 }
 0x892   : > { %v4155_v38 = vpop.f32.mrb[11].mxu0  ;;  %v4160_v37 = vpop.f32.mrb[17].mxu1 }
 0x895   : > { %v3093_v42 = vpop.f32.mrb[12].mxu0  ;;  %v3166_v46 = vpop.f32.mrb[18].mxu1 }
 0x896   : > { %v3170_v39 = vcombine.low %v2947_v32, %v3093_v42  ;;  %v3171_v41 = vcombine.high %v2947_v32, %v3093_v42  ;;  %v3186_v48 = vcombine.low %v3020_v35, %v3166_v46  ;;  %v3187_v49 = vcombine.high %v3020_v35, %v3166_v46  ;;  %v4165_v24 = vpop.f32.mrb[13].mxu0  ;;  %v4170_v25 = vpop.f32.mrb[19].mxu1 }
 0x897   : > { %v3461_v24 = vld [vmem:[%s4589_s3] sm:$0xff]  ;;  %v3462_v25 = vld [vmem:[%s4589_s3 + $0x8] sm:$0xff] }
 0x898   : > { %v3178_v60 = vrot.slane %v3170_v39, %v4672_v56  ;;  %v3185_v43 = vrot.slane %v3171_v41, %v4672_v56  ;;  %v3194_v30 = vrot.slane %v3186_v48, %v4672_v56  ;;  %v3201_v44 = vrot.slane %v3187_v49, %v4672_v56 }
 0x89a   : > { %v3202_v50 = vcombine.low %v3178_v60, %v3194_v30  ;;  %v3203_v51 = vcombine.high %v3178_v60, %v3194_v30  ;;  %v3218_v52 = vcombine.low %v3185_v43, %v3201_v44  ;;  %v3219_v53 = vcombine.high %v3185_v43, %v3201_v44  ;;  %v3463_v60 = vld [vmem:[%s4589_s3 + $0x10] sm:$0xff]  ;;  %v3464_v30 = vld [vmem:[%s4589_s3 + $0x18] sm:$0xff] }
 0x89b   : > { %v4244_v43 = vpack.c.bf16 %v3462_v25, %v3461_v24  ;;  %v4248_v44 = vpack.c.bf16 %v3464_v30, %v3463_v60 }
 0x89c   : > { %v3210_v57 = vrot.slane %v3202_v50, %v4682_v1  ;;  %v3217_v58 = vrot.slane %v3203_v51, %v4682_v1  ;;  %v3226_v59 = vrot.slane %v3218_v52, %v4682_v1  ;;  %v3233_v61 = vrot.slane %v3219_v53, %v4682_v1 }
 0x89d   : > { %4245 = vmatprep.subr.bf16.mxu1 %v4244_v43 }
 0x89e   : > { %v3238_v2 = vcombine.low %v3210_v57, %v3217_v58  ;;  %v3990_v3 = vcombine.high %v3210_v57, %v3217_v58  ;;  %v3254_v4 = vcombine.low %v3226_v59, %v3233_v61  ;;  %v3991_v5 = vcombine.high %v3226_v59, %v3233_v61  ;;  %v3995_v58 = vld [vmem:[%s670_s13] ss:$0 sm:$0xff] }
 0x89f   : > { %v3996_v61 = vld [vmem:[%s673_s21] ss:$0 sm:$0xff] }
 0x8a0   : > { %v3245_v6 = vrot.slane %v3238_v2, %v4672_v56  ;;  %v3253_v7 = vrot.slane %v3990_v3, %v4672_v56  ;;  %v3261_v8 = vrot.slane %v3254_v4, %v4672_v56  ;;  %v3269_v10 = vrot.slane %v3991_v5, %v4672_v56 }
 0x8a2   : > { %v3271_v11 = vcombine.high %v3245_v6, %v3253_v7  ;;  %v3287_v12 = vcombine.high %v3261_v8, %v3269_v10  ;;  %v3270_v13 = vcombine.low %v3245_v6, %v3253_v7  ;;  %v3286_v15 = vcombine.low %v3261_v8, %v3269_v10  ;;  %v3607_v7 = vld [vmem:[%s4599_s27] sm:$0xff]  ;;  %v3608_v8 = vld [vmem:[%s4599_s27 + $0x8] sm:$0xff] }
 0x8a3   : > { %v4252_v10 = vpack.c.bf16 %v3608_v8, %v3607_v7 }
 0x8a4   : > { %v3285_v16 = vrot.slane %v3271_v11, %v4682_v1  ;;  %v3301_v17 = vrot.slane %v3287_v12, %v4682_v1  ;;  %v3278_v18 = vrot.slane %v3270_v13, %v4682_v1  ;;  %v3294_v19 = vrot.slane %v3286_v15, %v4682_v1  ;;  %v3609_v11 = vld [vmem:[%s4599_s27 + $0x10] sm:$0xff]  ;;  %v3610_v12 = vld [vmem:[%s4599_s27 + $0x18] sm:$0xff]  ;;  %v3611_v15 = vld [vmem:[%s4599_s27 + $0x20] sm:$0xff] }
 0x8a5   : > { %4253 = vmatprep.subr.bf16.mxu0 %v4252_v10  ;;  %v4256_v13 = vpack.c.bf16 %v3610_v12, %v3609_v11 }
 0x8a6   : > { %v3305_v20 = vcombine.high %v3285_v16, %v3301_v17  ;;  %v3303_v21 = vcombine.high %v3278_v18, %v3294_v19  ;;  %v3304_v22 = vcombine.low %v3285_v16, %v3301_v17  ;;  %v3302_v23 = vcombine.low %v3278_v18, %v3294_v19  ;;  %4255 = vmatpush3.bf16.msra.mxu0 %v4252_v10  ;;  %v3612_v16 = vld [vmem:[%s4599_s27 + $0x28] sm:$0xff]  ;;  %v3613_v18 = vld [vmem:[%s4599_s27 + $0x30] sm:$0xff]  ;;  %v3614_v19 = vld [vmem:[%s4599_s27 + $0x38] sm:$0xff] }
 0x8a7   : > { %4257 = vmatprep.subr.bf16.mxu0 %v4256_v13  ;;  %v4260_v17 = vpack.c.bf16 %v3612_v16, %v3611_v15 }
 0x8a8   : > { %3315 = vrot.lane.b32.xlu1 %v3305_v20, %s4444_s14  ;;  %3307 = vrot.lane.b32.xlu0 %v3303_v21, %s4442_s22  ;;  %v4264_v20 = vpack.c.bf16 %v3614_v19, %v3613_v18  ;;  %v3615_v21 = vld [vmem:[%s4599_s27 + $0x40] sm:$0xff]  ;;  %s5169_s22 = sld [smem:[#allocation13_spill]] (!%p4001_p6) }
 0x8aa   : > { %4259 = vmatpush3.bf16.msra.mxu0 %v4256_v13 }
 0x8ab   : > { %4261 = vmatprep.subr.bf16.mxu0 %v4260_v17 }
 0x8ac   : > { %3311 = vrot.lane.b32.xlu0 %v3304_v22, %s4443_s19  ;;  %v3616_v22 = vld [vmem:[%s4599_s27 + $0x48] sm:$0xff] }
 0x8ae   : > { %4263 = vmatpush3.bf16.msra.mxu0 %v4260_v17 }
 0x8af   : > { %4265 = vmatprep.subr.bf16.mxu0 %v4264_v20 }
 0x8b2   : > { %4267 = vmatpush3.bf16.msra.mxu0 %v4264_v20 }
 0x91a   : > { %v3308_v56 = vpop.permute.xlu0 %3307  ;;  %v3316_v29 = vpop.permute.xlu1 %3315 }
 0x91b   : > { %v3318_v47 = vsel %vm1284_vm3, %v3302_v23, %v3308_v56  ;;  %v4268_v23 = vpack.c.bf16 %v3616_v22, %v3615_v21  ;;  %v3617_v56 = vld [vmem:[%s4599_s27 + $0x50] sm:$0xff] }
 0x91d   : > { %4269 = vmatprep.subr.bf16.mxu0 %v4268_v23 }
 0x91e   : > { %v3312_v28 = vpop.permute.xlu0 %3311  ;;  %4271 = vmatpush3.bf16.msra.mxu0 %v4268_v23 }
 0x91f   : > { %v3319_v45 = vsel %vm2080_vm5, %v3318_v47, %v3312_v28  ;;  %v3618_v47 = vld [vmem:[%s4599_s27 + $0x58] sm:$0xff] }
 0x920   : > { %v3320_v1 = vsel %vm2082_vm6, %v3319_v45, %v3316_v29  ;;  %v4272_v28 = vpack.c.bf16 %v3618_v47, %v3617_v56  ;;  %v3619_v29 = vld [vmem:[%s4599_s27 + $0x60] sm:$0xff]  ;;  %v3620_v45 = vld [vmem:[%s4599_s27 + $0x68] sm:$0xff] }
 0x921   : > { %4180 = vmatmul.mubr.msk.f32.vlgmr.msra.gmra.mrb[20].mxu1 %vm703_vm1, %v3320_v1  ;;  %v4276_v1 = vpack.c.bf16 %v3620_v45, %v3619_v29  ;;  %v4000_v29 = vld [vmem:[%s689_s16] ss:$0 sm:$0xff]  ;;  %s5168_s16 = sld [smem:[#allocation12_spill]] (!%p4001_p6) }
 0x922   : > { %4247 = vmatpush3.bf16.msra.mxu1 %v4244_v43  ;;  %4273 = vmatprep.subr.bf16.mxu0 %v4272_v28 }
 0x923   : > { %4249 = vmatprep.subr.bf16.mxu1 %v4248_v44  ;;  %4275 = vmatpush3.bf16.msra.mxu0 %v4272_v28 }
 0x924   : > { %4277 = vmatprep.subr.bf16.mxu0 %v4276_v1 }
 0x926   : > { %4251 = vmatpush3.bf16.msra.mxu1 %v4248_v44 }
 0x927   : > { %4279 = vmatpush3.bf16.msra.mxu0 %v4276_v1 }
 0x9f4   : > { %v4181_v33 = vpop.f32.mrb[20].mxu1 }
 0x9f5   : > { %v3407_v27 = vadd.f32 %v4375_v34, %v4181_v33  ;;  %v3397_v14 = vpop.f32.mrb[21].mxu1  ;;  %v3621_v33 = vld [vmem:[%s4599_s27 + $0x70] sm:$0xff] }
 0x9f6   : > { %v3406_v40 = vadd.f32 %v4376_v36, %v3397_v14 }
 0x9f7   : > { %v5027_v31 = vadd.f32 %v3994_v26, %v3407_v27  ;;  %v3997_v27 = vld [vmem:[%s681_s5] ss:$0 sm:$0xff] }
 0x9f8   : > { %v5029_v62 = vadd.f32 %v3994_v26, %v3406_v40  ;;  %v3622_v26 = vld [vmem:[%s4599_s27 + $0x78] sm:$0xff] }
 0x9f9   : > { %v3422_v63 = vsel %vm703_vm1, %v5027_v31, 0.0  ;;  %v4280_v34 = vpack.c.bf16 %v3622_v26, %v3621_v33 }
 0x9fa   : > { %3423 = vadd.xlane.f32.xlu1 %v3422_v63  ;;  %v3419_v9 = vsel %vm703_vm1, %v5029_v62, 0.0 }
 0x9fb   : > { %3420 = vadd.xlane.f32.xlu0 %v3419_v9  ;;  %4281 = vmatprep.subr.bf16.mxu0 %v4280_v34 }
 0x9fc   : > { %4283 = vmatpush3.bf16.msra.mxu0 %v4280_v34 }
 0xa87   : > { %v3424_v32 = vpop.xlane.xlu1 %3423 }
 0xa88   : > { %v3426_v35 = vmul.f32 0.03125, %v3424_v32  ;;  %v3421_v38 = vpop.xlane.xlu0 %3420 }
 0xa89   : > { %v3425_v37 = vmul.f32 0.03125, %v3421_v38 }
 0xa8a   : > { %v3428_v42 = vsub.f32 %v5027_v31, %v3426_v35 }
 0xa8b   : > { %v3427_v46 = vsub.f32 %v5029_v62, %v3425_v37 }
 0xa8c   : > { %v3430_v48 = vmul.f32 %v3428_v42, %v3428_v42 }
 0xa8d   : > { %v3429_v39 = vmul.f32 %v3427_v46, %v3427_v46 }
 0xa8e   : > { %v3434_v49 = vsel %vm703_vm1, %v3430_v48, 0.0 }
 0xa8f   : > { %v3431_v41 = vsel %vm703_vm1, %v3429_v39, 0.0 }
 0xa90   : > { %3432 = vadd.xlane.f32.xlu0 %v3431_v41 }
 0xa94   : > { %3435 = vadd.xlane.f32.xlu0 %v3434_v49 }
 0xb1d   : > { %v3433_v50 = vpop.xlane.xlu0 %3432 }
 0xb1e   : > { %v3437_v51 = vmul.f32 0.03125, %v3433_v50 }
 0xb20   : > { %v3439_v52 = vadd.f32 1e-06, %v3437_v51 }
 0xb21   : > { %v3436_v53 = vpop.xlane.xlu0 %3435 }
 0xb22   : > { %4363 = vrsqrt.f32 %v3439_v52  ;;  %v3438_v54 = vmul.f32 0.03125, %v3436_v53 }
 0xb24   : > { %v3440_v55 = vadd.f32 1e-06, %v3438_v54 }
 0xb26   : > { %4365 = vrsqrt.f32 %v3440_v55 }
 0xb2c   : > { %v4364_v57 = vpop.eup %4363 }
 0xb2d   : > { %v3443_v59 = vmul.f32 %v4364_v57, %v3427_v46 }
 0xb2f   : > { %v3451_v0 = vmul.f32 %v3995_v58, %v3443_v59 }
 0xb30   : > { %v4366_v2 = vpop.eup %4365 }
 0xb31   : > { %v3444_v3 = vmul.f32 %v4366_v2, %v3428_v42  ;;  %v3459_v4 = vadd.f32 %v3996_v61, %v3451_v0 }
 0xb33   : > { %v3452_v5 = vmul.f32 %v3995_v58, %v3444_v3  ;;  %4190 = vmatprep.mubr.msk.f32.mxu1 %vm703_vm1, %v3459_v4 }
 0xb35   : > { %v3460_v6 = vadd.f32 %v3996_v61, %v3452_v5 }
 0xb37   : > { %4191 = vmatmul.mubr.msk.f32.vlgmr.msra.gmra.mrb[22].mxu1 %vm703_vm1, %v3460_v6 }
 0xc0a   : > { %v4192_v14 = vpop.f32.mrb[22].mxu1 }
 0xc0b   : > { %v3550_v36 = vadd.f32 %v4192_v14, %v3997_v27  ;;  %v3544_v40 = vpop.f32.mrb[23].mxu1 }
 0xc0c   : > { %v3545_v63 = vadd.f32 %v3997_v27, %v3544_v40 }
 0xc0d   : > { %v3556_v9 = vmul.f32 0.70710677, %v3550_v36  ;;  %v3554_v23 = vmul.f32 0.5, %v3550_v36 }
 0xc0e   : > { %v3555_v32 = vmul.f32 0.70710677, %v3545_v63  ;;  %v3553_v21 = vmul.f32 0.5, %v3545_v63 }
 0xc0f   : > { %v3558_v35 = vand.u32 2147483647, %v3556_v9  ;;  %vm3598_vm7 = vcmp.ge.f32.partialorder %v3556_v9, 0.0 }
 0xc10   : > { %v3557_v38 = vand.u32 2147483647, %v3555_v32  ;;  %vm3597_vm8 = vcmp.ge.f32.partialorder %v3555_v32, 0.0 }
 0xc11   : > { %v3560_v37 = vmul.f32 0.3275911, %v3558_v35  ;;  %v3586_v41 = vsub.f32 0.0, %v3558_v35 }
 0xc12   : > { %v3559_v42 = vmul.f32 0.3275911, %v3557_v38  ;;  %v3585_v48 = vsub.f32 0.0, %v3557_v38 }
 0xc13   : > { %v3562_v46 = vadd.f32 1.0, %v3560_v37  ;;  %v3588_v24 = vmul.f32 %v3586_v41, %v3558_v35 }
 0xc14   : > { %v3561_v39 = vadd.f32 1.0, %v3559_v42  ;;  %v3587_v43 = vmul.f32 %v3585_v48, %v3557_v38  ;;  %v4002_v42 = vld [vmem:[%s5168_s16] ss:$0 sm:$0xff] (!%p4001_p6) }
 0xc15   : > { %4367 = vrcp.f32 %v3562_v46  ;;  %v3591_v50 = vmul.f32 1.442695, %v3588_v24 }
 0xc16   : > { %4369 = vrcp.f32 %v3561_v39  ;;  %v3589_v53 = vmul.f32 1.442695, %v3587_v43  ;;  %v4003_v39 = vld [vmem:[%s5169_s22] ss:$0 sm:$0xff] (!%p4001_p6) }
 0xc17   : > { %4371 = vpow2.f32 %v3591_v50 }
 0xc18   : > { %4373 = vpow2.f32 %v3589_v53 }
 0xc1f   : > { %v4368_v49 = vpop.eup %4367 }
 0xc20   : > { %v4370_v25 = vpop.eup %4369  ;;  %v3568_v60 = vmul.f32 1.0614054, %v4368_v49 }
 0xc21   : > { %v3567_v30 = vmul.f32 1.0614054, %v4370_v25  ;;  %v4372_v7 = vpop.eup %4371 }
 0xc22   : > { %v3570_v44 = vadd.f32 -1.4531521, %v3568_v60  ;;  %v4374_v10 = vpop.eup %4373 }
 0xc23   : > { %v3569_v51 = vadd.f32 -1.4531521, %v3567_v30 }
 0xc24   : > { %v3572_v52 = vmul.f32 %v4368_v49, %v3570_v44 }
 0xc25   : > { %v3571_v54 = vmul.f32 %v4370_v25, %v3569_v51 }
 0xc26   : > { %v3574_v55 = vadd.f32 1.4214138, %v3572_v52 }
 0xc27   : > { %v3573_v57 = vadd.f32 1.4214138, %v3571_v54 }
 0xc28   : > { %v3576_v58 = vmul.f32 %v4368_v49, %v3574_v55 }
 0xc29   : > { %v3575_v59 = vmul.f32 %v4370_v25, %v3573_v57 }
 0xc2a   : > { %v3578_v61 = vadd.f32 -0.28449672, %v3576_v58 }
 0xc2b   : > { %v3577_v0 = vadd.f32 -0.28449672, %v3575_v59 }
 0xc2c   : > { %v3580_v2 = vmul.f32 %v4368_v49, %v3578_v61 }
 0xc2d   : > { %v3579_v3 = vmul.f32 %v4370_v25, %v3577_v0 }
 0xc2e   : > { %v3582_v4 = vadd.f32 0.2548296, %v3580_v2 }
 0xc2f   : > { %v3581_v5 = vadd.f32 0.2548296, %v3579_v3 }
 0xc30   : > { %v3584_v6 = vmul.f32 %v4368_v49, %v3582_v4 }
 0xc31   : > { %v3583_v8 = vmul.f32 %v4370_v25, %v3581_v5 }
 0xc32   : > { %v3594_v11 = vmul.f32 %v4372_v7, %v3584_v6 }
 0xc33   : > { %v3593_v12 = vmul.f32 %v4374_v10, %v3583_v8 }
 0xc34   : > { %v3596_v13 = vsub.f32 1.0, %v3594_v11 }
 0xc35   : > { %v3595_v15 = vsub.f32 1.0, %v3593_v12 }
 0xc36   : > { %v3600_v16 = vsub.f32 0.0, %v3596_v13 }
 0xc37   : > { %v3599_v17 = vsub.f32 0.0, %v3595_v15 }
 0xc38   : > { %v3602_v18 = vsel %vm3598_vm7, %v3596_v13, %v3600_v16 }
 0xc39   : > { %v3604_v19 = vadd.f32 1.0, %v3602_v18  ;;  %v3601_v20 = vsel %vm3597_vm8, %v3595_v15, %v3599_v17 }
 0xc3a   : > { %v3603_v22 = vadd.f32 1.0, %v3601_v20 }
 0xc3b   : > { %v3606_v47 = vmul.f32 %v3604_v19, %v3554_v23 }
 0xc3c   : > { %v3605_v56 = vmul.f32 %v3603_v22, %v3553_v21 }
 0xc3e   : > { %4225 = vmatprep.mubr.f32.mxu0 %v3605_v56 }
 0xc3f   : > { %4226 = vmatmul.mubr.f32.vlgmr.msra.gmra.mrb[14].mxu0 %v3606_v47 }
 0xd12   : > { %v4227_v28 = vpop.f32.mrb[14].mxu0  ;;  %3714 = sbr.rel (%p4001_p6) target bundleno = 3668 (0xe54), region = 88 }
 0xd13   : > { %v3699_v45 = vadd.f32 %v4227_v28, %v5027_v31  ;;  %v3689_v1 = vpop.f32.mrb[15].mxu0 }
 0xd14   : > { %v3698_v33 = vadd.f32 %v3689_v1, %v5029_v62 }
 0xd15   : > { %v3708_v26 = vadd.f32 %v4000_v29, %v3699_v45 }
 0xd16   : > { %v3707_v34 = vadd.f32 %v4000_v29, %v3698_v33 }
 0xd17   : > { %3710 = vst.msk [vmem:[#allocation2 + $0x8] sm:$0xff] %vm703_vm1, %v3708_v26  ;;  %v3716_v27 = vrot.slane (!%p4001_p6), %v3708_v26, 7 }
 0xd18   : > { %3709 = vst.msk [vmem:[#allocation2] sm:$0xff] %vm703_vm1, %v3707_v34 }
 0xd19   : > { %v3719_v14 = vsel %vm3718_vm9, %v3707_v34, %v3716_v27 }
 0xd1a   : > { %v3723_v36 = vsel %vm3722_vm10, %v3719_v14, 0.0 }
 0xd1b   : > { %3724 = vadd.xlane.f32.xlu0 %v3723_v36 }
 0xda8   : > { %v3725_v31 = vpop.xlane.xlu0 %3724 }
 0xda9   : > { %v3726_v40 = vmul.f32 0.03125, %v3725_v31 }
 0xdab   : > { %v3727_v63 = vsub.f32 %v3719_v14, %v3726_v40 }
 0xdad   : > { %v3728_v62 = vmul.f32 %v3727_v63, %v3727_v63 }
 0xdaf   : > { %v3729_v9 = vsel %vm3722_vm10, %v3728_v62, 0.0 }
 0xdb0   : > { %3730 = vadd.xlane.f32.xlu0 %v3729_v9 }
 0xe3d   : > { %v3731_v32 = vpop.xlane.xlu0 %3730 }
 0xe3e   : > { %v3732_v35 = vmul.f32 0.03125, %v3731_v32 }
 0xe40   : > { %v3733_v38 = vadd.f32 1e-06, %v3732_v35 }
 0xe42   : > { %4377 = vrsqrt.f32 %v3733_v38 }
 0xe4c   : > { %v4378_v37 = vpop.eup %4377 }
 0xe4d   : > { %v3735_v46 = vmul.f32 %v4378_v37, %v3727_v63 }
 0xe4f   : > { %v3742_v41 = vmul.f32 %v4002_v42, %v3735_v46 }
 0xe51   : > { %v3749_v48 = vadd.f32 %v4003_v39, %v3742_v41 }
 0xe53   : > { %3750 = vst.msk [vmem:[#allocation3] sm:$0x3] %vm3722_vm10, %v3749_v48 }
 0xe54 PF: > { %s5170_s19 = sld [smem:[#allocation7_spill]]  ;;  %s4445_s29 = smov [#allocation3]  }
 0xe55   : > { %s3760_s28 = sshll.u32 %s4445_s29, 4  ;;  %s3761_s28 = int_to_ptr.vmem [resolvable:$true] %s3760_s28 }
 0xe56   : > { %s4379_s17 = scalar_lea.vmem %s3761_s28, 32  ;;  %p4386_p11 = scmp.lt.s32.totalorder %s3761_s28, %s3761_s28 }
 0xe57   : > { %p4380_p8 = scmp.ne.s32.totalorder %s3761_s28, %s4379_s17  ;;  %p4387_p12 = scmp.lt.s32.totalorder %s4379_s17, %s4379_s17 }
 0xe59   : > { %p4388_p13 = por %p4387_p12, %p4386_p11 }
 0xe5a   : > { %s5171_s14 = sadd.s32 4294967295, %s5170_s19  }
 0xe5b   : > { %p5097_p7 = scmp.eq.s32.totalorder %s5171_s14, 1 }
 0xe5d   : > { %p4381_p9 = pnand %p4380_p8, %p5097_p7 }
 0xe5f   : > { %p4382_p10 = pneg %p4381_p9 }
 0xe61   : > { %p4389_p0 = pnand %p4388_p13, %p4382_p10 }
 0xe63   : > { %4392 = shalt.err (!%p4389_p0)
}
 0xe64   : > { %s5173_s3 = sld [smem:[#allocation14_spill]] }
 0xe6a   : > { %s4393_s25 = scalar_lea.hbm %s5173_s3, 32 }
 0xe6b   : > { %p4394_p1 = scmp.ne.s32.totalorder %s5173_s3, %s4393_s25  ;;  %p4399_p4 = scmp.lt.u32.totalorder %s4393_s25, %s5173_s3 }
 0xe6d   : > { %p4395_p2 = pnand %p4394_p1, %p5097_p7 }
 0xe6f   : > { %p4396_p3 = pneg %p4395_p2 }
 0xe71   : > { %p4401_p5 = pnand %p4399_p4, %p4396_p3 }
 0xe73   : > { %4404 = shalt.err (!%p4401_p5)
}
 0xe74   : > { %4285 = dma.vmem_to_hbm [thread:$0]  (%p5097_p7), %s3761_s28, 32, %s5173_s3, [#allocation4]  }
 0xe75   : > { %4418 = dma.done.wait (%p5097_p7), [#allocation4], 32  }
 0xe76   : > { %4420 = vsyncadd (%p5097_p7), [#allocation4], 4294967264 }
 0xe77 PF: > { %s5174_s16 = sld [smem:[#allocation7_spill]]  ;;  %s5175_s18 = sld [smem:[#allocation6_spill]] }
 0xe78   : > { %s5176_s19 = sld [smem:[#allocation8_spill]] }
 0xe7d   : > { %s26_s20 = sadd.s32 1, %s5174_s16  }
 0xe7e   : > { %p23_p6 = scmp.ge.s32.totalorder %s26_s20, 4  }
 0xe80   :  { %25 = sbr.rel (!%p23_p6) target bundleno = 8 (0x8), region = 152 }
 0xe87   :  { %3773 = vsyncpa [#allocation4], 1 }
 0xe88   :  { %3775 = vsyncpa [#allocation4 + $0x1], 1 }

</bundles_post_ra>
